<compile_context>
chip_gen: v7x
topology: tpu7x:2x2x1
jax: 0.10.0
libtpu: 0.0.40
codegen_flags: <defaults>
</compile_context>

<pallas_src>
import functools

import jax
import jax.numpy as jnp
from jax.experimental import pallas as pl
from jax.experimental.pallas import tpu as pltpu


# True (unpadded) layer widths of the PyTorch module (out_dim=3):
#   512 -> 256 -> 100 -> 100 -> 100 -> 100 -> 100 -> 100 -> 100 -> 100 -> 3
TRUE_DIMS = [512, 256, 100, 100, 100, 100, 100, 100, 100, 100, 3]
NUM_LAYERS = len(TRUE_DIMS) - 1  # 10 Linear layers
OUT_DIM = TRUE_DIMS[-1]

PAD = 128      # lane-dense padded width for the 100-wide / 3-wide dims
N_MID = 7      # number of (true) 100x100 hidden layers (layers 2..8)


def _round_up(x, m):
    return (x + m - 1) // m * m


def _mlp_kernel(x_ref, w0_ref, b0_ref, w1_ref, b1_ref,
                wmid_ref, bmid_ref, wlast_ref, blast_ref, out_ref):
    """One batch tile: 10 fused MXU matmuls with f32 bias add + ReLU on the VPU.

    Compute (MXU operand) dtype is taken from the resident weights (f32 or
    bf16); accumulation is always f32 via preferred_element_type.
    """
    cdt = w0_ref.dtype

    def layer(h, w, b, relu=True):
        acc = jnp.dot(h, w, preferred_element_type=jnp.float32) + b
        if relu:
            acc = jnp.maximum(acc, 0.0)
        return acc

    h = x_ref[...]                                        # already compute dtype
    h = layer(h, w0_ref[...], b0_ref[...]).astype(cdt)    # 512 -> 256
    h = layer(h, w1_ref[...], b1_ref[...]).astype(cdt)    # 256 -> 128 (true 100)
    for i in range(N_MID):                                # 7x 128 -> 128 (true 100)
        h = layer(h, wmid_ref[i], bmid_ref[i]).astype(cdt)
    # Last layer: true 100 -> 3 (only first 3 cols meaningful), no ReLU.
    out_ref[...] = layer(h, wlast_ref[...], blast_ref[...],
                         relu=False).astype(out_ref.dtype)


def _choose_tile(batch, tile_b, min_steps=2):
    """Batch tile (multiple of 8) and padded batch.

    Targets at least `min_steps` grid steps so the "parallel" batch axis can be
    split across both v7x TensorCores, while keeping padding waste to <8 rows
    per tile (tb derived from the batch, not a fixed 1024).
    """
    padded8 = _round_up(batch, 8)
    n_steps = max(1, -(-padded8 // tile_b))
    if padded8 >= min_steps * 8:
        n_steps = max(n_steps, min_steps)
    tb = _round_up(-(-padded8 // n_steps), 8)
    return tb, tb * n_steps


@functools.partial(jax.jit, static_argnames=("tile_b",))
def unified_dropout_regressor_forward(x, packed_params, *, tile_b=1024):
    """x: (B, 512) float32.  packed_params: tuple from pack_params().

    Returns (B, 3) float32.  Compute dtype (f32 or bf16) follows the dtype the
    weights were packed in.
    """
    batch = x.shape[0]
    compute_dtype = packed_params[0].dtype
    tb, padded_batch = _choose_tile(batch, tile_b)
    grid = (padded_batch // tb,)

    x = x.astype(compute_dtype)          # bf16 x halves the dominant HBM read
    if padded_batch != batch:
        x = jnp.pad(x, ((0, padded_batch - batch), (0, 0)))

    def resident(a):
        # Full-array block, same block index every grid step -> fetched once,
        # stays resident in VMEM.  (pipeline_mode=pl.Buffered(1) would drop the
        # redundant second buffer, ~0.6 MiB in bf16; left at default here.)
        return pl.BlockSpec(a.shape, lambda i, _nd=a.ndim: (0,) * _nd)

    in_specs = [pl.BlockSpec((tb, TRUE_DIMS[0]), lambda i: (i, 0))]
    in_specs += [resident(a) for a in packed_params]
    out_specs = pl.BlockSpec((tb, PAD), lambda i: (i, 0))

    item = jnp.dtype(compute_dtype).itemsize
    param_bytes = int(sum(int(p.size) * p.dtype.itemsize for p in packed_params))
    per_row_macs = (TRUE_DIMS[0] * TRUE_DIMS[1] + TRUE_DIMS[1] * PAD
                    + N_MID * PAD * PAD + PAD * PAD)            # 294912 padded MACs
    cost = pl.CostEstimate(
        flops=2 * per_row_macs * padded_batch,
        transcendentals=0,
        bytes_accessed=padded_batch * (TRUE_DIMS[0] + PAD) * item + param_bytes)

    # Double-buffered x/out tiles + (double-buffered) resident params + f32
    # intermediates headroom.  Only raise the scoped limit when needed (v5e
    # defaults to 16 MiB scoped; v6e/v7x to 32 MiB).
    vmem_est = (2 * tb * (TRUE_DIMS[0] + PAD) * item
                + 2 * param_bytes
                + 4 * tb * PAD * 4)
    vmem_limit = None
    if vmem_est > (12 << 20):
        vmem_limit = min(int(vmem_est * 2), 48 << 20)

    out_padded = pl.pallas_call(
        _mlp_kernel,
        out_shape=jax.ShapeDtypeStruct((padded_batch, PAD), compute_dtype),
        grid=grid,
        in_specs=in_specs,
        out_specs=out_specs,
        compiler_params=pltpu.CompilerParams(
            dimension_semantics=("parallel",),
            vmem_limit_bytes=vmem_limit),
        cost_estimate=cost,
    )(x, *packed_params)

    return out_padded[:batch, :OUT_DIM].astype(jnp.float32)


def init_raw_params(key):
    """nn.Linear-style init at the TRUE (unpadded) shapes.

    Weight stored transposed vs PyTorch: (in, out), bias (out,).
    """
    params = []
    for i in range(NUM_LAYERS):
        d_in, d_out = TRUE_DIMS[i], TRUE_DIMS[i + 1]
        key, kw, kb = jax.random.split(key, 3)
        bound = d_in ** -0.5
        w = jax.random.uniform(kw, (d_in, d_out), jnp.float32, -bound, bound)
        b = jax.random.uniform(kb, (d_out,), jnp.float32, -bound, bound)
        params.append((w, b))
    return params


def pack_params(raw, dtype=jnp.bfloat16):
    """Zero-pad 100 -> 128 and 3 -> 128, stack the seven 128x128 hidden layers.

    Weights are stored in `dtype` (bf16 default: native MXU operand path on
    v5e/v6e/v7x, halves resident VMEM and the one-time weight DMA).  Biases
    stay f32 — they are added to the f32 accumulator, so no precision loss and
    no extra VALU work.
    """
    def pad_to(a, shape):
        return jnp.pad(a, [(0, s - d) for d, s in zip(a.shape, shape)])

    (w0, b0), (w1, b1) = raw[0], raw[1]
    w0p = w0.astype(dtype)                                  # (512, 256)
    b0p = b0.reshape(1, -1).astype(jnp.float32)             # (1, 256)
    w1p = pad_to(w1, (TRUE_DIMS[1], PAD)).astype(dtype)     # (256, 128)
    b1p = pad_to(b1.reshape(1, -1), (1, PAD)).astype(jnp.float32)
    wmid = jnp.stack([pad_to(raw[i][0], (PAD, PAD))
                      for i in range(2, 2 + N_MID)]).astype(dtype)      # (7,128,128)
    bmid = jnp.stack([pad_to(raw[i][1].reshape(1, -1), (1, PAD))
                      for i in range(2, 2 + N_MID)]).astype(jnp.float32)  # (7,1,128)
    wlast = pad_to(raw[-1][0], (PAD, PAD)).astype(dtype)    # (128,128), true (100,3)
    blast = pad_to(raw[-1][1].reshape(1, -1), (1, PAD)).astype(jnp.float32)
    return (w0p, b0p, w1p, b1p, wmid, bmid, wlast, blast)


def reference_forward(x, raw):
    """Pure-JAX f32 reference at the true (unpadded) shapes."""
    h = x
    for i, (w, b) in enumerate(raw):
        h = h @ w + b
        if i < NUM_LAYERS - 1:
            h = jnp.maximum(h, 0.0)
    return h


if __name__ == "__main__":
    key = jax.random.PRNGKey(0)
    key, kx = jax.random.split(key)

    batch = 8
    x = jax.random.normal(kx, (batch, TRUE_DIMS[0]), jnp.float32)

    raw = init_raw_params(key)
    ref = reference_forward(x, raw)

    # Strict-tolerance f32 operand path (validation configuration).
    out_f32 = unified_dropout_regressor_forward(
        x, pack_params(raw, dtype=jnp.float32))
    out_f32 = jax.block_until_ready(out_f32)
    assert out_f32.shape == (batch, OUT_DIM), out_f32.shape
    assert jnp.allclose(out_f32, ref, atol=1e-4, rtol=1e-4), (
        float(jnp.max(jnp.abs(out_f32 - ref))))

    # Production bf16 operand path (native MXU dtype, f32 accumulation).
    out_bf16 = unified_dropout_regressor_forward(
        x, pack_params(raw, dtype=jnp.bfloat16))
    out_bf16 = jax.block_until_ready(out_bf16)
    assert out_bf16.shape == (batch, OUT_DIM), out_bf16.shape
    assert jnp.allclose(out_bf16, ref, atol=5e-2, rtol=5e-2), (
        float(jnp.max(jnp.abs(out_bf16 - ref))))

    print("KERNEL_OK")
</pallas_src>

<mosaic_0001>
module attributes {stable_mosaic.version = 11 : i64} {
  func.func @_mlp_kernel(%arg0: i32, %arg1: memref<8x512xf32, #tpu.memory_space<vmem>>, %arg2: memref<512x256xf32, #tpu.memory_space<vmem>>, %arg3: memref<1x256xf32, #tpu.memory_space<vmem>>, %arg4: memref<256x128xf32, #tpu.memory_space<vmem>>, %arg5: memref<1x128xf32, #tpu.memory_space<vmem>>, %arg6: memref<7x128x128xf32, #tpu.memory_space<vmem>>, %arg7: memref<7x1x128xf32, #tpu.memory_space<vmem>>, %arg8: memref<128x128xf32, #tpu.memory_space<vmem>>, %arg9: memref<1x128xf32, #tpu.memory_space<vmem>>, %arg10: memref<8x128xf32, #tpu.memory_space<vmem>>) attributes {dimension_semantics = [#tpu.dimension_semantics<parallel>], iteration_bounds = array<i64: 1>, scalar_prefetch = 0 : i64, scratch_operands = 0 : i64, tpu.core_type = #tpu.core_type<tc>, window_params = [{transform_indices = @transform_0, window_bounds = array<i64: 8, 512>}, {pipeline_mode = #tpu.pipeline_mode<synchronous>, transform_indices = @transform_1, window_bounds = array<i64: 512, 256>}, {pipeline_mode = #tpu.pipeline_mode<synchronous>, transform_indices = @transform_2, window_bounds = array<i64: 1, 256>}, {pipeline_mode = #tpu.pipeline_mode<synchronous>, transform_indices = @transform_3, window_bounds = array<i64: 256, 128>}, {pipeline_mode = #tpu.pipeline_mode<synchronous>, transform_indices = @transform_4, window_bounds = array<i64: 1, 128>}, {pipeline_mode = #tpu.pipeline_mode<synchronous>, transform_indices = @transform_5, window_bounds = array<i64: 7, 128, 128>}, {pipeline_mode = #tpu.pipeline_mode<synchronous>, transform_indices = @transform_6, window_bounds = array<i64: 7, 1, 128>}, {pipeline_mode = #tpu.pipeline_mode<synchronous>, transform_indices = @transform_7, window_bounds = array<i64: 128, 128>}, {pipeline_mode = #tpu.pipeline_mode<synchronous>, transform_indices = @transform_8, window_bounds = array<i64: 1, 128>}, {transform_indices = @transform_9, window_bounds = array<i64: 8, 128>}]} {
    %c0 = arith.constant 0 : index
    %c0_0 = arith.constant 0 : index
    %0 = vector.load %arg1[%c0, %c0_0] : memref<8x512xf32, #tpu.memory_space<vmem>>, vector<8x512xf32>
    %c0_1 = arith.constant 0 : index
    %c0_2 = arith.constant 0 : index
    %1 = vector.load %arg2[%c0_1, %c0_2] : memref<512x256xf32, #tpu.memory_space<vmem>>, vector<512x256xf32>
    %c0_3 = arith.constant 0 : index
    %c0_4 = arith.constant 0 : index
    %2 = vector.load %arg3[%c0_3, %c0_4] : memref<1x256xf32, #tpu.memory_space<vmem>>, vector<1x256xf32>
    %cst = arith.constant dense<0.000000e+00> : vector<8x256xf32>
    %3 = tpu.matmul %0, %1, %cst {dimension_numbers = #tpu.dot_dimension_numbers<[1], [0], [0], [1], [0, 0, 1, 1], [], []>} : vector<8x512xf32>, vector<512x256xf32>, vector<8x256xf32> -> vector<8x256xf32>
    %4 = vector.broadcast %2 : vector<1x256xf32> to vector<8x256xf32>
    %5 = arith.addf %3, %4 : vector<8x256xf32>
    %cst_5 = arith.constant 0.000000e+00 : f32
    %6 = vector.broadcast %cst_5 : f32 to vector<8x256xf32>
    %7 = arith.maximumf %5, %6 : vector<8x256xf32>
    %c0_6 = arith.constant 0 : index
    %c0_7 = arith.constant 0 : index
    %8 = vector.load %arg4[%c0_6, %c0_7] : memref<256x128xf32, #tpu.memory_space<vmem>>, vector<256x128xf32>
    %c0_8 = arith.constant 0 : index
    %c0_9 = arith.constant 0 : index
    %9 = vector.load %arg5[%c0_8, %c0_9] : memref<1x128xf32, #tpu.memory_space<vmem>>, vector<1x128xf32>
    %cst_10 = arith.constant dense<0.000000e+00> : vector<8x128xf32>
    %10 = tpu.matmul %7, %8, %cst_10 {dimension_numbers = #tpu.dot_dimension_numbers<[1], [0], [0], [1], [0, 0, 1, 1], [], []>} : vector<8x256xf32>, vector<256x128xf32>, vector<8x128xf32> -> vector<8x128xf32>
    %11 = vector.broadcast %9 : vector<1x128xf32> to vector<8x128xf32>
    %12 = arith.addf %10, %11 : vector<8x128xf32>
    %cst_11 = arith.constant 0.000000e+00 : f32
    %13 = vector.broadcast %cst_11 : f32 to vector<8x128xf32>
    %14 = arith.maximumf %12, %13 : vector<8x128xf32>
    %c0_12 = arith.constant 0 : index
    %c0_13 = arith.constant 0 : index
    %c0_14 = arith.constant 0 : index
    %15 = vector.load %arg6[%c0_12, %c0_13, %c0_14] : memref<7x128x128xf32, #tpu.memory_space<vmem>>, vector<1x128x128xf32>
    %16 = vector.shape_cast %15 : vector<1x128x128xf32> to vector<128x128xf32>
    %c0_15 = arith.constant 0 : index
    %c0_16 = arith.constant 0 : index
    %c0_17 = arith.constant 0 : index
    %17 = vector.load %arg7[%c0_15, %c0_16, %c0_17] : memref<7x1x128xf32, #tpu.memory_space<vmem>>, vector<1x1x128xf32>
    %18 = vector.shape_cast %17 : vector<1x1x128xf32> to vector<1x128xf32>
    %cst_18 = arith.constant dense<0.000000e+00> : vector<8x128xf32>
    %19 = tpu.matmul %14, %16, %cst_18 {dimension_numbers = #tpu.dot_dimension_numbers<[1], [0], [0], [1], [0, 0, 1, 1], [], []>} : vector<8x128xf32>, vector<128x128xf32>, vector<8x128xf32> -> vector<8x128xf32>
    %20 = vector.broadcast %18 : vector<1x128xf32> to vector<8x128xf32>
    %21 = arith.addf %19, %20 : vector<8x128xf32>
    %cst_19 = arith.constant 0.000000e+00 : f32
    %22 = vector.broadcast %cst_19 : f32 to vector<8x128xf32>
    %23 = arith.maximumf %21, %22 : vector<8x128xf32>
    %c1 = arith.constant 1 : index
    %c0_20 = arith.constant 0 : index
    %c0_21 = arith.constant 0 : index
    %24 = vector.load %arg6[%c1, %c0_20, %c0_21] : memref<7x128x128xf32, #tpu.memory_space<vmem>>, vector<1x128x128xf32>
    %25 = vector.shape_cast %24 : vector<1x128x128xf32> to vector<128x128xf32>
    %c1_22 = arith.constant 1 : index
    %c0_23 = arith.constant 0 : index
    %c0_24 = arith.constant 0 : index
    %26 = vector.load %arg7[%c1_22, %c0_23, %c0_24] : memref<7x1x128xf32, #tpu.memory_space<vmem>>, vector<1x1x128xf32>
    %27 = vector.shape_cast %26 : vector<1x1x128xf32> to vector<1x128xf32>
    %cst_25 = arith.constant dense<0.000000e+00> : vector<8x128xf32>
    %28 = tpu.matmul %23, %25, %cst_25 {dimension_numbers = #tpu.dot_dimension_numbers<[1], [0], [0], [1], [0, 0, 1, 1], [], []>} : vector<8x128xf32>, vector<128x128xf32>, vector<8x128xf32> -> vector<8x128xf32>
    %29 = vector.broadcast %27 : vector<1x128xf32> to vector<8x128xf32>
    %30 = arith.addf %28, %29 : vector<8x128xf32>
    %cst_26 = arith.constant 0.000000e+00 : f32
    %31 = vector.broadcast %cst_26 : f32 to vector<8x128xf32>
    %32 = arith.maximumf %30, %31 : vector<8x128xf32>
    %c2 = arith.constant 2 : index
    %c0_27 = arith.constant 0 : index
    %c0_28 = arith.constant 0 : index
    %33 = vector.load %arg6[%c2, %c0_27, %c0_28] : memref<7x128x128xf32, #tpu.memory_space<vmem>>, vector<1x128x128xf32>
    %34 = vector.shape_cast %33 : vector<1x128x128xf32> to vector<128x128xf32>
    %c2_29 = arith.constant 2 : index
    %c0_30 = arith.constant 0 : index
    %c0_31 = arith.constant 0 : index
    %35 = vector.load %arg7[%c2_29, %c0_30, %c0_31] : memref<7x1x128xf32, #tpu.memory_space<vmem>>, vector<1x1x128xf32>
    %36 = vector.shape_cast %35 : vector<1x1x128xf32> to vector<1x128xf32>
    %cst_32 = arith.constant dense<0.000000e+00> : vector<8x128xf32>
    %37 = tpu.matmul %32, %34, %cst_32 {dimension_numbers = #tpu.dot_dimension_numbers<[1], [0], [0], [1], [0, 0, 1, 1], [], []>} : vector<8x128xf32>, vector<128x128xf32>, vector<8x128xf32> -> vector<8x128xf32>
    %38 = vector.broadcast %36 : vector<1x128xf32> to vector<8x128xf32>
    %39 = arith.addf %37, %38 : vector<8x128xf32>
    %cst_33 = arith.constant 0.000000e+00 : f32
    %40 = vector.broadcast %cst_33 : f32 to vector<8x128xf32>
    %41 = arith.maximumf %39, %40 : vector<8x128xf32>
    %c3 = arith.constant 3 : index
    %c0_34 = arith.constant 0 : index
    %c0_35 = arith.constant 0 : index
    %42 = vector.load %arg6[%c3, %c0_34, %c0_35] : memref<7x128x128xf32, #tpu.memory_space<vmem>>, vector<1x128x128xf32>
    %43 = vector.shape_cast %42 : vector<1x128x128xf32> to vector<128x128xf32>
    %c3_36 = arith.constant 3 : index
    %c0_37 = arith.constant 0 : index
    %c0_38 = arith.constant 0 : index
    %44 = vector.load %arg7[%c3_36, %c0_37, %c0_38] : memref<7x1x128xf32, #tpu.memory_space<vmem>>, vector<1x1x128xf32>
    %45 = vector.shape_cast %44 : vector<1x1x128xf32> to vector<1x128xf32>
    %cst_39 = arith.constant dense<0.000000e+00> : vector<8x128xf32>
    %46 = tpu.matmul %41, %43, %cst_39 {dimension_numbers = #tpu.dot_dimension_numbers<[1], [0], [0], [1], [0, 0, 1, 1], [], []>} : vector<8x128xf32>, vector<128x128xf32>, vector<8x128xf32> -> vector<8x128xf32>
    %47 = vector.broadcast %45 : vector<1x128xf32> to vector<8x128xf32>
    %48 = arith.addf %46, %47 : vector<8x128xf32>
    %cst_40 = arith.constant 0.000000e+00 : f32
    %49 = vector.broadcast %cst_40 : f32 to vector<8x128xf32>
    %50 = arith.maximumf %48, %49 : vector<8x128xf32>
    %c4 = arith.constant 4 : index
    %c0_41 = arith.constant 0 : index
    %c0_42 = arith.constant 0 : index
    %51 = vector.load %arg6[%c4, %c0_41, %c0_42] : memref<7x128x128xf32, #tpu.memory_space<vmem>>, vector<1x128x128xf32>
    %52 = vector.shape_cast %51 : vector<1x128x128xf32> to vector<128x128xf32>
    %c4_43 = arith.constant 4 : index
    %c0_44 = arith.constant 0 : index
    %c0_45 = arith.constant 0 : index
    %53 = vector.load %arg7[%c4_43, %c0_44, %c0_45] : memref<7x1x128xf32, #tpu.memory_space<vmem>>, vector<1x1x128xf32>
    %54 = vector.shape_cast %53 : vector<1x1x128xf32> to vector<1x128xf32>
    %cst_46 = arith.constant dense<0.000000e+00> : vector<8x128xf32>
    %55 = tpu.matmul %50, %52, %cst_46 {dimension_numbers = #tpu.dot_dimension_numbers<[1], [0], [0], [1], [0, 0, 1, 1], [], []>} : vector<8x128xf32>, vector<128x128xf32>, vector<8x128xf32> -> vector<8x128xf32>
    %56 = vector.broadcast %54 : vector<1x128xf32> to vector<8x128xf32>
    %57 = arith.addf %55, %56 : vector<8x128xf32>
    %cst_47 = arith.constant 0.000000e+00 : f32
    %58 = vector.broadcast %cst_47 : f32 to vector<8x128xf32>
    %59 = arith.maximumf %57, %58 : vector<8x128xf32>
    %c5 = arith.constant 5 : index
    %c0_48 = arith.constant 0 : index
    %c0_49 = arith.constant 0 : index
    %60 = vector.load %arg6[%c5, %c0_48, %c0_49] : memref<7x128x128xf32, #tpu.memory_space<vmem>>, vector<1x128x128xf32>
    %61 = vector.shape_cast %60 : vector<1x128x128xf32> to vector<128x128xf32>
    %c5_50 = arith.constant 5 : index
    %c0_51 = arith.constant 0 : index
    %c0_52 = arith.constant 0 : index
    %62 = vector.load %arg7[%c5_50, %c0_51, %c0_52] : memref<7x1x128xf32, #tpu.memory_space<vmem>>, vector<1x1x128xf32>
    %63 = vector.shape_cast %62 : vector<1x1x128xf32> to vector<1x128xf32>
    %cst_53 = arith.constant dense<0.000000e+00> : vector<8x128xf32>
    %64 = tpu.matmul %59, %61, %cst_53 {dimension_numbers = #tpu.dot_dimension_numbers<[1], [0], [0], [1], [0, 0, 1, 1], [], []>} : vector<8x128xf32>, vector<128x128xf32>, vector<8x128xf32> -> vector<8x128xf32>
    %65 = vector.broadcast %63 : vector<1x128xf32> to vector<8x128xf32>
    %66 = arith.addf %64, %65 : vector<8x128xf32>
    %cst_54 = arith.constant 0.000000e+00 : f32
    %67 = vector.broadcast %cst_54 : f32 to vector<8x128xf32>
    %68 = arith.maximumf %66, %67 : vector<8x128xf32>
    %c6 = arith.constant 6 : index
    %c0_55 = arith.constant 0 : index
    %c0_56 = arith.constant 0 : index
    %69 = vector.load %arg6[%c6, %c0_55, %c0_56] : memref<7x128x128xf32, #tpu.memory_space<vmem>>, vector<1x128x128xf32>
    %70 = vector.shape_cast %69 : vector<1x128x128xf32> to vector<128x128xf32>
    %c6_57 = arith.constant 6 : index
    %c0_58 = arith.constant 0 : index
    %c0_59 = arith.constant 0 : index
    %71 = vector.load %arg7[%c6_57, %c0_58, %c0_59] : memref<7x1x128xf32, #tpu.memory_space<vmem>>, vector<1x1x128xf32>
    %72 = vector.shape_cast %71 : vector<1x1x128xf32> to vector<1x128xf32>
    %cst_60 = arith.constant dense<0.000000e+00> : vector<8x128xf32>
    %73 = tpu.matmul %68, %70, %cst_60 {dimension_numbers = #tpu.dot_dimension_numbers<[1], [0], [0], [1], [0, 0, 1, 1], [], []>} : vector<8x128xf32>, vector<128x128xf32>, vector<8x128xf32> -> vector<8x128xf32>
    %74 = vector.broadcast %72 : vector<1x128xf32> to vector<8x128xf32>
    %75 = arith.addf %73, %74 : vector<8x128xf32>
    %cst_61 = arith.constant 0.000000e+00 : f32
    %76 = vector.broadcast %cst_61 : f32 to vector<8x128xf32>
    %77 = arith.maximumf %75, %76 : vector<8x128xf32>
    %c0_62 = arith.constant 0 : index
    %c0_63 = arith.constant 0 : index
    %78 = vector.load %arg8[%c0_62, %c0_63] : memref<128x128xf32, #tpu.memory_space<vmem>>, vector<128x128xf32>
    %c0_64 = arith.constant 0 : index
    %c0_65 = arith.constant 0 : index
    %79 = vector.load %arg9[%c0_64, %c0_65] : memref<1x128xf32, #tpu.memory_space<vmem>>, vector<1x128xf32>
    %cst_66 = arith.constant dense<0.000000e+00> : vector<8x128xf32>
    %80 = tpu.matmul %77, %78, %cst_66 {dimension_numbers = #tpu.dot_dimension_numbers<[1], [0], [0], [1], [0, 0, 1, 1], [], []>} : vector<8x128xf32>, vector<128x128xf32>, vector<8x128xf32> -> vector<8x128xf32>
    %81 = vector.broadcast %79 : vector<1x128xf32> to vector<8x128xf32>
    %82 = arith.addf %80, %81 : vector<8x128xf32>
    %c0_67 = arith.constant 0 : index
    %c0_68 = arith.constant 0 : index
    %83 = vector.load %arg10[%c0_67, %c0_68] : memref<8x128xf32, #tpu.memory_space<vmem>>, vector<8x128xf32>
    tpu.vector_store %arg10[%c0_67, %c0_68], %82 {strides = array<i32>} : memref<8x128xf32, #tpu.memory_space<vmem>>, vector<8x128xf32>,
    return
  }
  func.func @transform_0(%arg0: i32) -> (i32, i32) {
    %c0_i32 = arith.constant 0 : i32
    %c0_i32_0 = arith.constant 0 : i32
    return %arg0, %c0_i32 : i32, i32
  }
  func.func @transform_1(%arg0: i32) -> (i32, i32) {
    %c0_i32 = arith.constant 0 : i32
    %c0_i32_0 = arith.constant 0 : i32
    %c0_i32_1 = arith.constant 0 : i32
    return %c0_i32, %c0_i32_0 : i32, i32
  }
  func.func @transform_2(%arg0: i32) -> (i32, i32) {
    %c0_i32 = arith.constant 0 : i32
    %c0_i32_0 = arith.constant 0 : i32
    %c0_i32_1 = arith.constant 0 : i32
    return %c0_i32, %c0_i32_0 : i32, i32
  }
  func.func @transform_3(%arg0: i32) -> (i32, i32) {
    %c0_i32 = arith.constant 0 : i32
    %c0_i32_0 = arith.constant 0 : i32
    %c0_i32_1 = arith.constant 0 : i32
    return %c0_i32, %c0_i32_0 : i32, i32
  }
  func.func @transform_4(%arg0: i32) -> (i32, i32) {
    %c0_i32 = arith.constant 0 : i32
    %c0_i32_0 = arith.constant 0 : i32
    %c0_i32_1 = arith.constant 0 : i32
    return %c0_i32, %c0_i32_0 : i32, i32
  }
  func.func @transform_5(%arg0: i32) -> (i32, i32, i32) {
    %c0_i32 = arith.constant 0 : i32
    %c0_i32_0 = arith.constant 0 : i32
    %c0_i32_1 = arith.constant 0 : i32
    %c0_i32_2 = arith.constant 0 : i32
    return %c0_i32, %c0_i32_0, %c0_i32_1 : i32, i32, i32
  }
  func.func @transform_6(%arg0: i32) -> (i32, i32, i32) {
    %c0_i32 = arith.constant 0 : i32
    %c0_i32_0 = arith.constant 0 : i32
    %c0_i32_1 = arith.constant 0 : i32
    %c0_i32_2 = arith.constant 0 : i32
    return %c0_i32, %c0_i32_0, %c0_i32_1 : i32, i32, i32
  }
  func.func @transform_7(%arg0: i32) -> (i32, i32) {
    %c0_i32 = arith.constant 0 : i32
    %c0_i32_0 = arith.constant 0 : i32
    %c0_i32_1 = arith.constant 0 : i32
    return %c0_i32, %c0_i32_0 : i32, i32
  }
  func.func @transform_8(%arg0: i32) -> (i32, i32) {
    %c0_i32 = arith.constant 0 : i32
    %c0_i32_0 = arith.constant 0 : i32
    %c0_i32_1 = arith.constant 0 : i32
    return %c0_i32, %c0_i32_0 : i32, i32
  }
  func.func @transform_9(%arg0: i32) -> (i32, i32) {
    %c0_i32 = arith.constant 0 : i32
    %c0_i32_0 = arith.constant 0 : i32
    return %arg0, %c0_i32 : i32, i32
  }
}

</mosaic_0001>

<bundles_post_ra>
// kernel: unified_dropout_regressor_forward.1
= control target key start
LH: loop header
LB: loop body
LE: loop exit
PB: predicated region body
PF: predicated region fallthrough
CT: control target
= control target key end

     0   :  { %14 = vsyncpa [#allocation3], 0  ;;  %s2461_s0 = inlined_call_operand.hbm [shape: f32[8,512], index: 0, kind: input, shape index: {}]   ;;  %s2462_s1 = inlined_call_operand.hbm [shape: f32[512,256], index: 1, kind: input, shape index: {}]   ;;  %s2463_s2 = inlined_call_operand.vmem [shape: f32[1,256], index: 2, kind: input, shape index: {}]   ;;  %s2464_s3 = inlined_call_operand.hbm [shape: f32[256,128], index: 3, kind: input, shape index: {}]   ;;  %s2465_s4 = inlined_call_operand.vmem [shape: f32[1,128], index: 4, kind: input, shape index: {}]   ;;  %s2466_s5 = inlined_call_operand.hbm [shape: f32[7,128,128], index: 5, kind: input, shape index: {}]   ;;  %s2467_s6 = inlined_call_operand.vmem [shape: f32[7,1,128], index: 6, kind: input, shape index: {}]   ;;  %s2468_s7 = inlined_call_operand.hbm [shape: f32[128,128], index: 7, kind: input, shape index: {}]   ;;  %s2469_s8 = inlined_call_operand.vmem [shape: f32[1,128], index: 8, kind: input, shape index: {}]   ;;  %s2470_s9 = inlined_call_operand.vmem [shape: f32[8,128], index: 9, kind: output, shape index: {}]  }
   0x1   :  { %15 = vsyncpa [#allocation5], 0 }
   0x2   :  { %16 = vsyncpa [#allocation8], 0  ;;  %s2217_s30 = smov [#allocation4]   ;;  %s2101_s13 = scalar_lea.hbm %s2462_s1, 16384 }
   0x3   :  { %s32_s10 = sshll.u32 %s2217_s30, 4  ;;  %p2102_p0 = scmp.ne.s32.totalorder %s2462_s1, %s2101_s13  ;;  %s33_s10 = int_to_ptr.vmem [resolvable:$true] %s32_s10 }
   0x4   :  { %p2105_p1 = scmp.lt.u32.totalorder %s2101_s13, %s2462_s1 }
   0x6   :  { %p2107_p2 = pnand %p2105_p1, %p2102_p0 }
   0x8   :  { %2110 = shalt.err (!%p2107_p2)
}
   0x9   :  { %s2111_s18 = scalar_lea.vmem %s33_s10, 16384  ;;  %p2116_p4 = scmp.lt.s32.totalorder %s33_s10, %s33_s10 }
   0xa   :  { %p2112_p3 = scmp.ne.s32.totalorder %s33_s10, %s2111_s18  ;;  %p2117_p5 = scmp.lt.s32.totalorder %s2111_s18, %s2111_s18 }
   0xc   :  { %p2118_p6 = por %p2117_p5, %p2116_p4 }
   0xe   :  { %p2119_p7 = pnand %p2118_p6, %p2112_p3 }
  0x10   :  { %2122 = shalt.err (!%p2119_p7)
}
  0x11   :  { %s2218_s19 = smov 256   ;;  %s2219_s20 = smov 16  }
  0x12   :  { %38 = dma.hbm_to_vmem [thread:$0]  %s2462_s1, 16384, %s33_s10, [#allocation5], %s2218_s19, %s2218_s19, %s2219_s20  }
  0x13   :  { %s2220_s23 = smov [#allocation7]   ;;  %s2221_s25 = smov [#allocation2]  }
  0x14   :  { %s60_s24 = sshll.u32 %s2220_s23, 4  ;;  %s23_s26 = sshll.u32 %s2221_s25, 4  ;;  %s61_s24 = int_to_ptr.vmem [resolvable:$true] %s60_s24  ;;  %s24_s26 = int_to_ptr.vmem [resolvable:$true] %s23_s26 }
  0x15   :  { %s2123_s29 = scalar_lea.hbm %s2466_s5, 14336 }
  0x16   :  { %p2124_p8 = scmp.ne.s32.totalorder %s2466_s5, %s2123_s29  ;;  %p2127_p9 = scmp.lt.u32.totalorder %s2123_s29, %s2466_s5 }
  0x18   :  { %p2129_p10 = pnand %p2127_p9, %p2124_p8 }
  0x1a   :  { %2132 = shalt.err (!%p2129_p10)
}
  0x1b   :  { %s2133_s1 = scalar_lea.vmem %s61_s24, 14336  ;;  %p2138_p12 = scmp.lt.s32.totalorder %s61_s24, %s61_s24 }
  0x1c   :  { %p2134_p11 = scmp.ne.s32.totalorder %s61_s24, %s2133_s1  ;;  %p2139_p13 = scmp.lt.s32.totalorder %s2133_s1, %s2133_s1 }
  0x1e   :  { %p2140_p0 = por %p2139_p13, %p2138_p12 }
  0x20   :  { %p2141_p1 = pnand %p2140_p0, %p2134_p11 }
  0x22   :  { %2144 = shalt.err (!%p2141_p1)
}
  0x23   :  { %s2222_s10 = smov 128   ;;  %s2223_s14 = smov 8  }
  0x24   :  { %66 = dma.hbm_to_vmem [thread:$0]  %s2466_s5, 14336, %s61_s24, [#allocation8], %s2222_s10, %s2222_s10, %s2223_s14  }
  0x25   :  { %s2145_s19 = scalar_lea.hbm %s2461_s0, 512 }
  0x26   :  { %p2146_p2 = scmp.ne.s32.totalorder %s2461_s0, %s2145_s19  ;;  %p2149_p3 = scmp.lt.u32.totalorder %s2145_s19, %s2461_s0 }
  0x28   :  { %p2151_p4 = pnand %p2149_p3, %p2146_p2 }
  0x2a   :  { %2154 = shalt.err (!%p2151_p4)
}
  0x2b   :  { %s2155_s25 = scalar_lea.vmem %s24_s26, 512  ;;  %p2160_p6 = scmp.lt.s32.totalorder %s24_s26, %s24_s26 }
  0x2c   :  { %p2156_p5 = scmp.ne.s32.totalorder %s24_s26, %s2155_s25  ;;  %p2161_p7 = scmp.lt.s32.totalorder %s2155_s25, %s2155_s25 }
  0x2e   :  { %p2162_p8 = por %p2161_p7, %p2160_p6 }
  0x30   :  { %p2163_p9 = pnand %p2162_p8, %p2156_p5 }
  0x32   :  { %2166 = shalt.err (!%p2163_p9)
}
  0x33   :  { %26 = dma.hbm_to_vmem [thread:$0]  %s2461_s0, 512, %s24_s26, [#allocation3]  }
  0x34   :  { %s2224_s27 = smov [#allocation6]   ;;  %s2225_s29 = smov [#allocation9]  }
  0x35   :  { %s46_s28 = sshll.u32 %s2224_s27, 4  ;;  %s74_s30 = sshll.u32 %s2225_s29, 4  ;;  %s47_s28 = int_to_ptr.vmem [resolvable:$true] %s46_s28  ;;  %s75_s30 = int_to_ptr.vmem [resolvable:$true] %s74_s30 }
  0x36   :  { %s2167_s13 = scalar_lea.hbm %s2464_s3, 4096 }
  0x37   :  { %p2168_p10 = scmp.ne.s32.totalorder %s2464_s3, %s2167_s13  ;;  %p2171_p11 = scmp.lt.u32.totalorder %s2167_s13, %s2464_s3 }
  0x39   :  { %p2173_p12 = pnand %p2171_p11, %p2168_p10 }
  0x3b   :  { %2176 = shalt.err (!%p2173_p12)
}
  0x3c   :  { %s2177_s0 = scalar_lea.vmem %s47_s28, 4096  ;;  %p2182_p0 = scmp.lt.s32.totalorder %s47_s28, %s47_s28 }
  0x3d   :  { %p2178_p13 = scmp.ne.s32.totalorder %s47_s28, %s2177_s0  ;;  %p2183_p1 = scmp.lt.s32.totalorder %s2177_s0, %s2177_s0 }
  0x3f   :  { %p2184_p2 = por %p2183_p1, %p2182_p0 }
  0x41   :  { %p2185_p3 = pnand %p2184_p2, %p2178_p13 }
  0x43   :  { %2188 = shalt.err (!%p2185_p3)
}
  0x44   :  { %52 = dma.hbm_to_vmem [thread:$0]  %s2464_s3, 4096, %s47_s28, [#allocation5], %s2222_s10, %s2222_s10, %s2223_s14  }
  0x45   :  { %s2189_s21 = scalar_lea.hbm %s2468_s7, 2048 }
  0x46   :  { %p2190_p4 = scmp.ne.s32.totalorder %s2468_s7, %s2189_s21  ;;  %p2193_p5 = scmp.lt.u32.totalorder %s2189_s21, %s2468_s7 }
  0x48   :  { %p2195_p6 = pnand %p2193_p5, %p2190_p4 }
  0x4a   :  { %2198 = shalt.err (!%p2195_p6)
}
  0x4b   :  { %s2199_s24 = scalar_lea.vmem %s75_s30, 2048  ;;  %p2204_p8 = scmp.lt.s32.totalorder %s75_s30, %s75_s30 }
  0x4c   :  { %p2200_p7 = scmp.ne.s32.totalorder %s75_s30, %s2199_s24  ;;  %p2205_p9 = scmp.lt.s32.totalorder %s2199_s24, %s2199_s24 }
  0x4e   :  { %p2206_p10 = por %p2205_p9, %p2204_p8 }
  0x50   :  { %p2207_p11 = pnand %p2206_p10, %p2200_p7 }
  0x52   :  { %2210 = shalt.err (!%p2207_p11)
}
  0x53   :  { %80 = dma.hbm_to_vmem [thread:$0]  %s2468_s7, 2048, %s75_s30, [#allocation8], %s2222_s10, %s2222_s10, %s2223_s14  }
  0x54   :  { %2211 = dma.done.wait [#allocation3], 512  }
  0x55   :  { %2212 = vsyncadd [#allocation3], 4294966784 }
  0x56   :  { %2213 = dma.done.wait [#allocation5], 20480  }
  0x57   :  { %2214 = vsyncadd [#allocation5], 4294946816 }
  0x58   :  { %2215 = dma.done.wait [#allocation8], 16384  }
  0x59   :  { %2216 = vsyncadd [#allocation8], 4294950912  ;;  %v103_v0 = vld [vmem:[#allocation4 + $0x8] sm:$0xff]  ;;  %v105_v1 = vld [vmem:[#allocation4 + $0x18] sm:$0xff]  ;;  %vm2227_vm0 = vmmov 0  }
  0x5a   :  { %v102_v2 = vld [vmem:[#allocation4] sm:$0xff]  ;;  %v1733_v3 = vpack.c.bf16 %v105_v1, %v103_v0  ;;  %v104_v4 = vld [vmem:[#allocation4 + $0x10] sm:$0xff]  ;;  %v107_v5 = vld [vmem:[#allocation4 + $0x28] sm:$0xff] }
  0x5b   :  { %v109_v6 = vld [vmem:[#allocation4 + $0x38] sm:$0xff]  ;;  %v1735_v7 = vpack.c.bf16 %v104_v4, %v102_v2  ;;  %v106_v9 = vld [vmem:[#allocation4 + $0x20] sm:$0xff]  ;;  %v108_v10 = vld [vmem:[#allocation4 + $0x30] sm:$0xff] }
  0x5c   :  { %v1737_v8 = vpack.c.bf16 %v109_v6, %v107_v5  ;;  %v111_v11 = vld [vmem:[#allocation4 + $0x48] sm:$0xff]  ;;  %1734 = vmatprep.subr.bf16.mxu0 %v1733_v3  ;;  %v113_v12 = vld [vmem:[#allocation4 + $0x58] sm:$0xff]  ;;  %v1739_v13 = vpack.c.bf16 %v108_v10, %v106_v9  ;;  %v110_v15 = vld [vmem:[#allocation4 + $0x40] sm:$0xff] }
  0x5d   :  { %1736 = vmatpush1.bf16.msra.mxu0 %v1735_v7  ;;  %v1741_v14 = vpack.c.bf16 %v113_v12, %v111_v11  ;;  %v112_v16 = vld [vmem:[#allocation4 + $0x50] sm:$0xff]  ;;  %v115_v17 = vld [vmem:[#allocation4 + $0x68] sm:$0xff]  ;;  %v117_v18 = vld [vmem:[#allocation4 + $0x78] sm:$0xff] }
  0x5e   :  { %1738 = vmatprep.subr.bf16.mxu0 %v1737_v8  ;;  %v1743_v19 = vpack.c.bf16 %v112_v16, %v110_v15  ;;  %v1745_v20 = vpack.c.bf16 %v117_v18, %v115_v17  ;;  %v114_v21 = vld [vmem:[#allocation4 + $0x60] sm:$0xff]  ;;  %v116_v22 = vld [vmem:[#allocation4 + $0x70] sm:$0xff]  ;;  %v119_v23 = vld [vmem:[#allocation4 + $0x88] sm:$0xff] }
  0x5f   :  { %v121_v24 = vld [vmem:[#allocation4 + $0x98] sm:$0xff]  ;;  %v1747_v25 = vpack.c.bf16 %v116_v22, %v114_v21  ;;  %v118_v27 = vld [vmem:[#allocation4 + $0x80] sm:$0xff]  ;;  %v120_v28 = vld [vmem:[#allocation4 + $0x90] sm:$0xff] }
  0x60   :  { %v1749_v26 = vpack.c.bf16 %v121_v24, %v119_v23  ;;  %v123_v29 = vld [vmem:[#allocation4 + $0xa8] sm:$0xff]  ;;  %v125_v30 = vld [vmem:[#allocation4 + $0xb8] sm:$0xff]  ;;  %v1751_v31 = vpack.c.bf16 %v120_v28, %v118_v27  ;;  %v122_v33 = vld [vmem:[#allocation4 + $0xa0] sm:$0xff] }
  0x61   :  { %1740 = vmatpush1.bf16.msra.mxu0 %v1739_v13  ;;  %v1753_v32 = vpack.c.bf16 %v125_v30, %v123_v29  ;;  %v124_v34 = vld [vmem:[#allocation4 + $0xb0] sm:$0xff]  ;;  %v127_v35 = vld [vmem:[#allocation4 + $0xc8] sm:$0xff]  ;;  %v129_v36 = vld [vmem:[#allocation4 + $0xd8] sm:$0xff] }
  0x62   :  { %1742 = vmatprep.subr.bf16.mxu0 %v1741_v14  ;;  %v1755_v37 = vpack.c.bf16 %v124_v34, %v122_v33  ;;  %v1757_v38 = vpack.c.bf16 %v129_v36, %v127_v35  ;;  %v126_v39 = vld [vmem:[#allocation4 + $0xc0] sm:$0xff]  ;;  %v128_v40 = vld [vmem:[#allocation4 + $0xd0] sm:$0xff]  ;;  %v99_v41 = vld [vmem:[#allocation2 + $0x8] sm:$0xff] }
  0x63   :  { %v131_v42 = vld [vmem:[#allocation4 + $0xe8] sm:$0xff]  ;;  %v133_v43 = vld [vmem:[#allocation4 + $0xf8] sm:$0xff]  ;;  %306 = vmatprep.mubr.f32.mxu0 %v99_v41  ;;  %v1759_v44 = vpack.c.bf16 %v128_v40, %v126_v39  ;;  %v130_v46 = vld [vmem:[#allocation4 + $0xe0] sm:$0xff] }
  0x64   :  { %v1761_v45 = vpack.c.bf16 %v133_v43, %v131_v42  ;;  %v132_v47 = vld [vmem:[#allocation4 + $0xf0] sm:$0xff]  ;;  %v135_v48 = vld [vmem:[#allocation4 + $0x108] sm:$0xff]  ;;  %v137_v49 = vld [vmem:[#allocation4 + $0x118] sm:$0xff] }
  0x65   :  { %1744 = vmatpush1.bf16.msra.mxu0 %v1743_v19  ;;  %v1763_v50 = vpack.c.bf16 %v132_v47, %v130_v46  ;;  %v1765_v51 = vpack.c.bf16 %v137_v49, %v135_v48  ;;  %v134_v52 = vld [vmem:[#allocation4 + $0x100] sm:$0xff]  ;;  %v136_v53 = vld [vmem:[#allocation4 + $0x110] sm:$0xff]  ;;  %v139_v54 = vld [vmem:[#allocation4 + $0x128] sm:$0xff] }
  0x66   :  { %1746 = vmatprep.subr.bf16.mxu0 %v1745_v20  ;;  %v141_v55 = vld [vmem:[#allocation4 + $0x138] sm:$0xff]  ;;  %v1767_v56 = vpack.c.bf16 %v136_v53, %v134_v52  ;;  %v138_v58 = vld [vmem:[#allocation4 + $0x120] sm:$0xff]  ;;  %v140_v59 = vld [vmem:[#allocation4 + $0x130] sm:$0xff] }
  0x67   :  { %v1769_v57 = vpack.c.bf16 %v141_v55, %v139_v54  ;;  %v143_v60 = vld [vmem:[#allocation4 + $0x148] sm:$0xff]  ;;  %v145_v61 = vld [vmem:[#allocation4 + $0x158] sm:$0xff]  ;;  %v1771_v62 = vpack.c.bf16 %v140_v59, %v138_v58  ;;  %v142_v0 = vld [vmem:[#allocation4 + $0x140] sm:$0xff] }
  0x68   :  { %v1773_v63 = vpack.c.bf16 %v145_v61, %v143_v60  ;;  %v144_v1 = vld [vmem:[#allocation4 + $0x150] sm:$0xff]  ;;  %v147_v2 = vld [vmem:[#allocation4 + $0x168] sm:$0xff]  ;;  %v149_v3 = vld [vmem:[#allocation4 + $0x178] sm:$0xff] }
  0x69   :  { %1748 = vmatpush1.bf16.msra.mxu0 %v1747_v25  ;;  %v1775_v4 = vpack.c.bf16 %v144_v1, %v142_v0  ;;  %v1777_v5 = vpack.c.bf16 %v149_v3, %v147_v2  ;;  %v146_v6 = vld [vmem:[#allocation4 + $0x160] sm:$0xff]  ;;  %v148_v7 = vld [vmem:[#allocation4 + $0x170] sm:$0xff]  ;;  %v151_v8 = vld [vmem:[#allocation4 + $0x188] sm:$0xff] }
  0x6a   :  { %1750 = vmatprep.subr.bf16.mxu0 %v1749_v26  ;;  %v153_v9 = vld [vmem:[#allocation4 + $0x198] sm:$0xff]  ;;  %v150_v10 = vld [vmem:[#allocation4 + $0x180] sm:$0xff]  ;;  %v152_v11 = vld [vmem:[#allocation4 + $0x190] sm:$0xff]  ;;  %v1779_v12 = vpack.c.bf16 %v148_v7, %v146_v6 }
  0x6b   :  { %v155_v13 = vld [vmem:[#allocation4 + $0x1a8] sm:$0xff]  ;;  %v157_v14 = vld [vmem:[#allocation4 + $0x1b8] sm:$0xff]  ;;  %v402_v15 = vld [vmem:[#allocation6 + $0x80] sm:$0xff]  ;;  %v1781_v18 = vpack.c.bf16 %v153_v9, %v151_v8  ;;  %v1783_v29 = vpack.c.bf16 %v152_v11, %v150_v10 }
  0x6c   :  { %v403_v16 = vld [vmem:[#allocation6 + $0x88] sm:$0xff]  ;;  %v386_v17 = vld [vmem:[#allocation6] sm:$0xff]  ;;  %v404_v21 = vld [vmem:[#allocation6 + $0x90] sm:$0xff]  ;;  %v1785_v33 = vpack.c.bf16 %v157_v14, %v155_v13 }
  0x6d   :  { %1752 = vmatpush1.bf16.msra.mxu0 %v1751_v31  ;;  %v1861_v19 = vpack.c.bf16 %v403_v16, %v402_v15  ;;  %v387_v20 = vld [vmem:[#allocation6 + $0x8] sm:$0xff]  ;;  %v405_v22 = vld [vmem:[#allocation6 + $0x98] sm:$0xff]  ;;  %v388_v25 = vld [vmem:[#allocation6 + $0x10] sm:$0xff] }
  0x6e   :  { %1754 = vmatprep.subr.bf16.mxu0 %v1753_v32  ;;  %v1863_v23 = vpack.c.bf16 %v387_v20, %v386_v17  ;;  %v1865_v24 = vpack.c.bf16 %v405_v22, %v404_v21  ;;  %v389_v26 = vld [vmem:[#allocation6 + $0x18] sm:$0xff]  ;;  %v406_v27 = vld [vmem:[#allocation6 + $0xa0] sm:$0xff]  ;;  %v407_v28 = vld [vmem:[#allocation6 + $0xa8] sm:$0xff] }
  0x6f   :  { %1862 = vmatprep.subr.bf16.mxu1 %v1861_v19  ;;  %v154_v30 = vld [vmem:[#allocation4 + $0x1a0] sm:$0xff]  ;;  %v156_v31 = vld [vmem:[#allocation4 + $0x1b0] sm:$0xff]  ;;  %v1867_v32 = vpack.c.bf16 %v389_v26, %v388_v25  ;;  %v159_v34 = vld [vmem:[#allocation4 + $0x1c8] sm:$0xff]  ;;  %v1869_v35 = vpack.c.bf16 %v407_v28, %v406_v27 }
  0x70   :  { %1864 = vmatpush3.bf16.msra.mxu1 %v1863_v23  ;;  %v390_v36 = vld [vmem:[#allocation6 + $0x20] sm:$0xff]  ;;  %v408_v39 = vld [vmem:[#allocation6 + $0xb0] sm:$0xff]  ;;  %v409_v40 = vld [vmem:[#allocation6 + $0xb8] sm:$0xff]  ;;  %v1787_v41 = vpack.c.bf16 %v156_v31, %v154_v30 }
  0x71   :  { %1756 = vmatpush1.bf16.msra.mxu0 %v1755_v37  ;;  %1866 = vmatprep.subr.bf16.mxu1 %v1865_v24  ;;  %v391_v37 = vld [vmem:[#allocation6 + $0x28] sm:$0xff]  ;;  %v158_v42 = vld [vmem:[#allocation4 + $0x1c0] sm:$0xff]  ;;  %v160_v43 = vld [vmem:[#allocation4 + $0x1d0] sm:$0xff]  ;;  %v1873_v47 = vpack.c.bf16 %v409_v40, %v408_v39 }
  0x72   :  { %1758 = vmatprep.subr.bf16.mxu0 %v1757_v38  ;;  %v161_v38 = vld [vmem:[#allocation4 + $0x1d8] sm:$0xff]  ;;  %v163_v46 = vld [vmem:[#allocation4 + $0x1e8] sm:$0xff]  ;;  %v392_v48 = vld [vmem:[#allocation6 + $0x30] sm:$0xff]  ;;  %v1791_v53 = vpack.c.bf16 %v160_v43, %v158_v42 }
  0x73   :  { %v393_v49 = vld [vmem:[#allocation6 + $0x38] sm:$0xff]  ;;  %v411_v52 = vld [vmem:[#allocation6 + $0xc8] sm:$0xff]  ;;  %v162_v54 = vld [vmem:[#allocation4 + $0x1e0] sm:$0xff] }
  0x74   :  { %1868 = vmatpush3.bf16.msra.mxu1 %v1867_v32  ;;  %v164_v55 = vld [vmem:[#allocation4 + $0x1f0] sm:$0xff]  ;;  %v167_v58 = vld [vmem:[#allocation4 + $0x208] sm:$0xff]  ;;  %v394_v60 = vld [vmem:[#allocation6 + $0x40] sm:$0xff] }
  0x75   :  { %1760 = vmatpush1.bf16.msra.mxu0 %v1759_v44  ;;  %v1871_v44 = vpack.c.bf16 %v391_v37, %v390_v36  ;;  %1870 = vmatprep.subr.bf16.mxu1 %v1869_v35  ;;  %v395_v61 = vld [vmem:[#allocation6 + $0x48] sm:$0xff]  ;;  %v413_v0 = vld [vmem:[#allocation6 + $0xd8] sm:$0xff]  ;;  %v1795_v1 = vpack.c.bf16 %v164_v55, %v162_v54  ;;  %v396_v9 = vld [vmem:[#allocation6 + $0x50] sm:$0xff] }
  0x76   :  { %1762 = vmatprep.subr.bf16.mxu0 %v1761_v45  ;;  %v1789_v45 = vpack.c.bf16 %v161_v38, %v159_v34  ;;  %v1879_v2 = vpack.c.bf16 %v395_v61, %v394_v60  ;;  %v171_v6 = vld [vmem:[#allocation4 + $0x228] sm:$0xff]  ;;  %v173_v8 = vld [vmem:[#allocation4 + $0x238] sm:$0xff]  ;;  %v414_v11 = vld [vmem:[#allocation6 + $0xe0] sm:$0xff] }
  0x77   :  { %v397_v10 = vld [vmem:[#allocation6 + $0x58] sm:$0xff]  ;;  %v98_v13 = vld [vmem:[#allocation2] sm:$0xff]  ;;  %v1801_v15 = vpack.c.bf16 %v173_v8, %v171_v6  ;;  %v172_v17 = vld [vmem:[#allocation4 + $0x230] sm:$0xff] }
  0x78   :  { %1872 = vmatpush3.bf16.msra.mxu1 %v1871_v44  ;;  %v170_v16 = vld [vmem:[#allocation4 + $0x220] sm:$0xff]  ;;  %v1883_v19 = vpack.c.bf16 %v397_v10, %v396_v9  ;;  %v175_v20 = vld [vmem:[#allocation4 + $0x248] sm:$0xff]  ;;  %v177_v21 = vld [vmem:[#allocation4 + $0x258] sm:$0xff] }
  0x79   :  { %1764 = vmatpush1.bf16.msra.mxu0 %v1763_v50  ;;  %v165_v50 = vld [vmem:[#allocation4 + $0x1f8] sm:$0xff]  ;;  %1874 = vmatprep.subr.bf16.mxu1 %v1873_v47  ;;  %v1803_v23 = vpack.c.bf16 %v172_v17, %v170_v16  ;;  %v1805_v24 = vpack.c.bf16 %v177_v21, %v175_v20  ;;  %v174_v25 = vld [vmem:[#allocation4 + $0x240] sm:$0xff]  ;;  %v176_v26 = vld [vmem:[#allocation4 + $0x250] sm:$0xff] }
  0x7a   :  { %1766 = vmatprep.subr.bf16.mxu0 %v1765_v51  ;;  %v410_v51 = vld [vmem:[#allocation6 + $0xc0] sm:$0xff]  ;;  %v179_v27 = vld [vmem:[#allocation4 + $0x268] sm:$0xff]  ;;  %v181_v28 = vld [vmem:[#allocation4 + $0x278] sm:$0xff] }
  0x7b   :  { %v1877_v59 = vpack.c.bf16 %v411_v52, %v410_v51  ;;  %v1809_v30 = vpack.c.bf16 %v181_v28, %v179_v27  ;;  %v178_v31 = vld [vmem:[#allocation4 + $0x260] sm:$0xff]  ;;  %v180_v32 = vld [vmem:[#allocation4 + $0x270] sm:$0xff]  ;;  %v185_v34 = vld [vmem:[#allocation4 + $0x298] sm:$0xff] }
  0x7c   :  { %v1811_v35 = vpack.c.bf16 %v180_v32, %v178_v31  ;;  %v182_v37 = vld [vmem:[#allocation4 + $0x280] sm:$0xff]  ;;  %v184_v38 = vld [vmem:[#allocation4 + $0x290] sm:$0xff]  ;;  %v187_v39 = vld [vmem:[#allocation4 + $0x2a8] sm:$0xff] }
  0x7d   :  { %1768 = vmatpush1.bf16.msra.mxu0 %v1767_v56  ;;  %v1875_v56 = vpack.c.bf16 %v393_v49, %v392_v48  ;;  %v189_v40 = vld [vmem:[#allocation4 + $0x2b8] sm:$0xff]  ;;  %v186_v43 = vld [vmem:[#allocation4 + $0x2a0] sm:$0xff]  ;;  %v188_v44 = vld [vmem:[#allocation4 + $0x2b0] sm:$0xff] }
  0x7e   :  { %1770 = vmatprep.subr.bf16.mxu0 %v1769_v57  ;;  %v1793_v57 = vpack.c.bf16 %v165_v50, %v163_v46  ;;  %v1817_v42 = vpack.c.bf16 %v189_v40, %v187_v39  ;;  %v193_v46 = vld [vmem:[#allocation4 + $0x2d8] sm:$0xff]  ;;  %v1819_v47 = vpack.c.bf16 %v188_v44, %v186_v43  ;;  %v190_v49 = vld [vmem:[#allocation4 + $0x2c0] sm:$0xff]  ;;  %v192_v50 = vld [vmem:[#allocation4 + $0x2d0] sm:$0xff] }
  0x7f   :  { %1876 = vmatpush3.bf16.msra.mxu1 %v1875_v56  ;;  %v195_v51 = vld [vmem:[#allocation4 + $0x2e8] sm:$0xff]  ;;  %v197_v52 = vld [vmem:[#allocation4 + $0x2f8] sm:$0xff]  ;;  %v194_v55 = vld [vmem:[#allocation4 + $0x2e0] sm:$0xff] }
  0x80   :  { %1878 = vmatprep.subr.bf16.mxu1 %v1877_v59  ;;  %v1825_v54 = vpack.c.bf16 %v197_v52, %v195_v51  ;;  %v196_v56 = vld [vmem:[#allocation4 + $0x2f0] sm:$0xff]  ;;  %v198_v61 = vld [vmem:[#allocation4 + $0x300] sm:$0xff]  ;;  %v209_v6 = vld [vmem:[#allocation4 + $0x358] sm:$0xff]  ;;  %v2226_v52 = vmov 0.0|0.0  }
  0x81   :  { %1772 = vmatpush1.bf16.msra.mxu0 %v1771_v62  ;;  %v169_v62 = vld [vmem:[#allocation4 + $0x218] sm:$0xff]  ;;  %v1827_v59 = vpack.c.bf16 %v196_v56, %v194_v55  ;;  %v206_v9 = vld [vmem:[#allocation4 + $0x340] sm:$0xff]  ;;  %v208_v10 = vld [vmem:[#allocation4 + $0x350] sm:$0xff] }
  0x82   :  { %1774 = vmatprep.subr.bf16.mxu0 %v1773_v63  ;;  %v412_v63 = vld [vmem:[#allocation6 + $0xd0] sm:$0xff]  ;;  %v1797_v3 = vpack.c.bf16 %v169_v62, %v167_v58  ;;  %v201_v58 = vld [vmem:[#allocation4 + $0x318] sm:$0xff]  ;;  %v215_v17 = vld [vmem:[#allocation4 + $0x388] sm:$0xff] }
  0x83   :  { %v1881_v7 = vpack.c.bf16 %v413_v0, %v412_v63  ;;  %1880 = vmatpush3.bf16.msra.mxu1 %v1879_v2  ;;  %v200_v62 = vld [vmem:[#allocation4 + $0x310] sm:$0xff]  ;;  %v203_v63 = vld [vmem:[#allocation4 + $0x328] sm:$0xff]  ;;  %v205_v0 = vld [vmem:[#allocation4 + $0x338] sm:$0xff] }
  0x84   :  { %v1833_v2 = vpack.c.bf16 %v205_v0, %v203_v63  ;;  %v212_v16 = vld [vmem:[#allocation4 + $0x370] sm:$0xff]  ;;  %v214_v21 = vld [vmem:[#allocation4 + $0x380] sm:$0xff]  ;;  %v399_v44 = vld [vmem:[#allocation6 + $0x68] sm:$0xff] }
  0x85   :  { %1776 = vmatpush1.bf16.msra.mxu0 %v1775_v4  ;;  %v166_v4 = vld [vmem:[#allocation4 + $0x200] sm:$0xff]  ;;  %1882 = vmatprep.subr.bf16.mxu1 %v1881_v7  ;;  %v220_v28 = vld [vmem:[#allocation4 + $0x3b0] sm:$0xff]  ;;  %v497_v0 = vld [vmem:[#allocation7 + $0x8] sm:$0xff] }
  0x86   :  { %1778 = vmatprep.subr.bf16.mxu0 %v1777_v5  ;;  %v168_v5 = vld [vmem:[#allocation4 + $0x210] sm:$0xff]  ;;  %v218_v27 = vld [vmem:[#allocation4 + $0x3a0] sm:$0xff] }
  0x87   :  { %v1799_v14 = vpack.c.bf16 %v168_v5, %v166_v4  ;;  %1884 = vmatpush3.bf16.msra.mxu1 %v1883_v19  ;;  %v204_v4 = vld [vmem:[#allocation4 + $0x330] sm:$0xff]  ;;  %v207_v5 = vld [vmem:[#allocation4 + $0x348] sm:$0xff]  ;;  %v1851_v31 = vpack.c.bf16 %v220_v28, %v218_v27  ;;  %v226_v39 = vld [vmem:[#allocation4 + $0x3e0] sm:$0xff] }
  0x88   :  { %v1837_v8 = vpack.c.bf16 %v209_v6, %v207_v5  ;;  %v228_v40 = vld [vmem:[#allocation4 + $0x3f0] sm:$0xff]  ;;  %v398_v43 = vld [vmem:[#allocation6 + $0x60] sm:$0xff]  ;;  %v499_v6 = vld [vmem:[#allocation7 + $0x18] sm:$0xff] }
  0x89   :  { %1780 = vmatpush1.bf16.msra.mxu0 %v1779_v12  ;;  %v415_v12 = vld [vmem:[#allocation6 + $0xe8] sm:$0xff]  ;;  %v230_v56 = vld [vmem:[%s2463_s2] sm:$0x3]  ;;  %v498_v5 = vld [vmem:[#allocation7 + $0x10] sm:$0xff] }
  0x8a   :  { %1782 = vmatprep.subr.bf16.mxu0 %v1781_v18  ;;  %v101_v18 = vld [vmem:[#allocation2 + $0x18] sm:$0xff]  ;;  %v1885_v22 = vpack.c.bf16 %v415_v12, %v414_v11  ;;  %v211_v11 = vld [vmem:[#allocation4 + $0x368] sm:$0xff]  ;;  %v496_v63 = vld [vmem:[#allocation7] sm:$0xff] }
  0x8b   :  { %v213_v12 = vld [vmem:[#allocation4 + $0x378] sm:$0xff]  ;;  %v1267_v28 = vld [vmem:[%s2465_s4] ss:$0 sm:$0xff] }
  0x8c   :  { %1886 = vmatprep.subr.bf16.mxu1 %v1885_v22  ;;  %v216_v22 = vld [vmem:[#allocation4 + $0x390] sm:$0xff] }
  0x8d   :  { %1784 = vmatpush1.bf16.msra.mxu0 %v1783_v29  ;;  %v1807_v29 = vpack.c.bf16 %v176_v26, %v174_v25  ;;  %v1847_v25 = vpack.c.bf16 %v216_v22, %v214_v21  ;;  %v509_v21 = vld [vmem:[#allocation7 + $0x68] sm:$0xff] }
  0x8e   :  { %1786 = vmatprep.subr.bf16.mxu0 %v1785_v33  ;;  %v183_v33 = vld [vmem:[#allocation4 + $0x288] sm:$0xff] }
  0x8f   :  { %v1813_v36 = vpack.c.bf16 %v185_v34, %v183_v33  ;;  %v222_v33 = vld [vmem:[#allocation4 + $0x3c0] sm:$0xff]  ;;  %v224_v34 = vld [vmem:[#allocation4 + $0x3d0] sm:$0xff] }
  0x91   :  { %1788 = vmatpush1.bf16.msra.mxu0 %v1787_v41  ;;  %v1815_v41 = vpack.c.bf16 %v184_v38, %v182_v37  ;;  %v1855_v37 = vpack.c.bf16 %v224_v34, %v222_v33 }
  0x92   :  { %1790 = vmatprep.subr.bf16.mxu0 %v1789_v45  ;;  %v191_v45 = vld [vmem:[#allocation4 + $0x2c8] sm:$0xff] }
  0x93   :  { %v1821_v48 = vpack.c.bf16 %v193_v46, %v191_v45  ;;  %v1887_v45 = vpack.c.bf16 %v399_v44, %v398_v43  ;;  %v416_v46 = vld [vmem:[#allocation6 + $0xf0] sm:$0xff]  ;;  %v598_v43 = vld [vmem:[#allocation7 + $0xb8] sm:$0xff] }
  0x95   :  { %1792 = vmatpush1.bf16.msra.mxu0 %v1791_v53  ;;  %v1823_v53 = vpack.c.bf16 %v192_v50, %v190_v49  ;;  %1888 = vmatpush3.bf16.msra.mxu1 %v1887_v45  ;;  %v400_v49 = vld [vmem:[#allocation6 + $0x70] sm:$0xff]  ;;  %v401_v50 = vld [vmem:[#allocation6 + $0x78] sm:$0xff]  ;;  %v599_v45 = vld [vmem:[#allocation7 + $0xc0] sm:$0xff] }
  0x96   :  { %1794 = vmatprep.subr.bf16.mxu0 %v1793_v57  ;;  %v199_v57 = vld [vmem:[#allocation4 + $0x308] sm:$0xff]  ;;  %v1891_v51 = vpack.c.bf16 %v401_v50, %v400_v49  ;;  %v602_v49 = vld [vmem:[#allocation7 + $0xd8] sm:$0xff] }
  0x97   :  { %v1829_v60 = vpack.c.bf16 %v201_v58, %v199_v57 }
  0x99   :  { %1796 = vmatpush1.bf16.msra.mxu0 %v1795_v1  ;;  %v1831_v1 = vpack.c.bf16 %v200_v62, %v198_v61 }
  0x9a   :  { %1798 = vmatprep.subr.bf16.mxu0 %v1797_v3  ;;  %v202_v3 = vld [vmem:[#allocation4 + $0x320] sm:$0xff] }
  0x9b   :  { %v1835_v7 = vpack.c.bf16 %v204_v4, %v202_v3  ;;  %v1894_v3 = vpack.c.bf16 %v497_v0, %v496_v63 }
  0x9c   :  { %307 = vmatmul.mubr.f32.vlgmr.msra.gmra.mrb[0].mxu0 %v98_v13  ;;  %v1839_v13 = vpack.c.bf16 %v208_v10, %v206_v9  ;;  %v501_v9 = vld [vmem:[#allocation7 + $0x28] sm:$0xff] }
  0x9d   :  { %1800 = vmatpush1.bf16.msra.mxu0 %v1799_v14  ;;  %377 = vmatprep.mubr.f32.mxu0 %v101_v18  ;;  %v1841_v14 = vpack.c.bf16 %v213_v12, %v211_v11  ;;  %v217_v18 = vld [vmem:[#allocation4 + $0x398] sm:$0xff]  ;;  %v502_v11 = vld [vmem:[#allocation7 + $0x30] sm:$0xff] }
  0x9e   :  { %1802 = vmatprep.subr.bf16.mxu0 %v1801_v15  ;;  %v210_v15 = vld [vmem:[#allocation4 + $0x360] sm:$0xff]  ;;  %v1845_v20 = vpack.c.bf16 %v217_v18, %v215_v17  ;;  %v503_v12 = vld [vmem:[#allocation7 + $0x38] sm:$0xff]  ;;  %v506_v17 = vld [vmem:[#allocation7 + $0x50] sm:$0xff] }
  0x9f   :  { %v1843_v19 = vpack.c.bf16 %v212_v16, %v210_v15  ;;  %v505_v15 = vld [vmem:[#allocation7 + $0x48] sm:$0xff]  ;;  %v507_v18 = vld [vmem:[#allocation7 + $0x58] sm:$0xff] }
  0xa1   :  { %1804 = vmatpush1.bf16.msra.mxu0 %v1803_v23  ;;  %v219_v23 = vld [vmem:[#allocation4 + $0x3a8] sm:$0xff] }
  0xa2   :  { %1806 = vmatprep.subr.bf16.mxu0 %v1805_v24  ;;  %v221_v24 = vld [vmem:[#allocation4 + $0x3b8] sm:$0xff] }
  0xa3   :  { %v1849_v26 = vpack.c.bf16 %v221_v24, %v219_v23  ;;  %v510_v23 = vld [vmem:[#allocation7 + $0x70] sm:$0xff]  ;;  %v511_v24 = vld [vmem:[#allocation7 + $0x78] sm:$0xff] }
  0xa5   :  { %1808 = vmatpush1.bf16.msra.mxu0 %v1807_v29  ;;  %v223_v29 = vld [vmem:[#allocation4 + $0x3c8] sm:$0xff] }
  0xa6   :  { %1810 = vmatprep.subr.bf16.mxu0 %v1809_v30  ;;  %v225_v30 = vld [vmem:[#allocation4 + $0x3d8] sm:$0xff] }
  0xa7   :  { %v1853_v32 = vpack.c.bf16 %v225_v30, %v223_v29 }
  0xa9   :  { %1812 = vmatpush1.bf16.msra.mxu0 %v1811_v35  ;;  %v227_v35 = vld [vmem:[#allocation4 + $0x3e8] sm:$0xff] }
  0xaa   :  { %1814 = vmatprep.subr.bf16.mxu0 %v1813_v36  ;;  %v229_v36 = vld [vmem:[#allocation4 + $0x3f8] sm:$0xff] }
  0xab   :  { %v1857_v38 = vpack.c.bf16 %v229_v36, %v227_v35  ;;  %v593_v36 = vld [vmem:[#allocation7 + $0x90] sm:$0xff] }
  0xad   :  { %1816 = vmatpush1.bf16.msra.mxu0 %v1815_v41  ;;  %v1859_v41 = vpack.c.bf16 %v228_v40, %v226_v39  ;;  %v595_v39 = vld [vmem:[#allocation7 + $0xa0] sm:$0xff]  ;;  %v596_v40 = vld [vmem:[#allocation7 + $0xa8] sm:$0xff] }
  0xae   :  { %1818 = vmatprep.subr.bf16.mxu0 %v1817_v42  ;;  %v100_v42 = vld [vmem:[#allocation2 + $0x10] sm:$0xff] }
  0xb1   :  { %1820 = vmatpush1.bf16.msra.mxu0 %v1819_v47  ;;  %v417_v47 = vld [vmem:[#allocation6 + $0xf8] sm:$0xff] }
  0xb2   :  { %1822 = vmatprep.subr.bf16.mxu0 %v1821_v48  ;;  %v1889_v48 = vpack.c.bf16 %v417_v47, %v416_v46  ;;  %v600_v46 = vld [vmem:[#allocation7 + $0xc8] sm:$0xff] }
  0xb3   :  { %v1930_v47 = vpack.c.bf16 %v600_v46, %v599_v45  ;;  %v1270_v45 = vld [vmem:[%s2467_s6 + $0x1] ss:$0 sm:$0xff] }
  0xb4   :  { %1890 = vmatprep.subr.bf16.mxu1 %v1889_v48  ;;  %v601_v48 = vld [vmem:[#allocation7 + $0xd0] sm:$0xff] }
  0xb5   :  { %1824 = vmatpush1.bf16.msra.mxu0 %v1823_v53  ;;  %1892 = vmatpush3.bf16.msra.mxu1 %v1891_v51  ;;  %v232_v53 = vlaneseq  ;;  %v1933_v50 = vpack.c.bf16 %v602_v49, %v601_v48  ;;  %v603_v51 = vld [vmem:[#allocation7 + $0xe0] sm:$0xff] }
  0xb6   :  { %1826 = vmatprep.subr.bf16.mxu0 %v1825_v54  ;;  %1893 = vmatprep.subr.bf16.mxu1 %v2226_v52 }
  0xb7   :  { %v233_v54 = vshrl.u32 %v232_v53, 7  ;;  %v604_v53 = vld [vmem:[#allocation7 + $0xe8] sm:$0xff] }
  0xb9   :  { %1828 = vmatpush1.bf16.msra.mxu0 %v1827_v59  ;;  %v234_v55 = vsub.s32 0, %v233_v54  ;;  %v238_v57 = vsub.s32 1, %v233_v54  ;;  %v1936_v54 = vpack.c.bf16 %v604_v53, %v603_v51  ;;  %v798_v51 = vld [vmem:[#allocation7 + $0x1f8] sm:$0xff] }
  0xba   :  { %1830 = vmatprep.subr.bf16.mxu0 %v1829_v60 }
  0xbb   :  { %v235_v58 = vrot.slane %v230_v56, %v234_v55  ;;  %v239_v59 = vrot.slane %v230_v56, %v238_v57  ;;  %v605_v55 = vld [vmem:[#allocation7 + $0xf0] sm:$0xff]  ;;  %v606_v56 = vld [vmem:[#allocation7 + $0xf8] sm:$0xff] }
  0xbc   :  { %v1939_v57 = vpack.c.bf16 %v606_v56, %v605_v55  ;;  %v880_v55 = vld [vmem:[#allocation7 + $0x208] sm:$0xff]  ;;  %v881_v56 = vld [vmem:[#allocation7 + $0x210] sm:$0xff] }
  0xbd   :  { %1832 = vmatpush1.bf16.msra.mxu0 %v1831_v1 }
  0xbe   :  { %1834 = vmatprep.subr.bf16.mxu0 %v1833_v2 }
  0xc1   :  { %1836 = vmatpush1.bf16.msra.mxu0 %v1835_v7  ;;  %v1897_v7 = vpack.c.bf16 %v499_v6, %v498_v5  ;;  %v691_v5 = vld [vmem:[#allocation7 + $0x120] sm:$0xff]  ;;  %v692_v6 = vld [vmem:[#allocation7 + $0x128] sm:$0xff] }
  0xc2   :  { %1838 = vmatprep.subr.bf16.mxu0 %v1837_v8  ;;  %v500_v8 = vld [vmem:[#allocation7 + $0x20] sm:$0xff] }
  0xc3   :  { %v1900_v10 = vpack.c.bf16 %v501_v9, %v500_v8  ;;  %v693_v8 = vld [vmem:[#allocation7 + $0x130] sm:$0xff]  ;;  %v694_v9 = vld [vmem:[#allocation7 + $0x138] sm:$0xff] }
  0xc5   :  { %1840 = vmatpush1.bf16.msra.mxu0 %v1839_v13  ;;  %v1903_v13 = vpack.c.bf16 %v503_v12, %v502_v11  ;;  %v695_v11 = vld [vmem:[#allocation7 + $0x140] sm:$0xff]  ;;  %v696_v12 = vld [vmem:[#allocation7 + $0x148] sm:$0xff] }
  0xc6   :  { %1842 = vmatprep.subr.bf16.mxu0 %v1841_v14  ;;  %v504_v14 = vld [vmem:[#allocation7 + $0x40] sm:$0xff] }
  0xc7   :  { %v1906_v16 = vpack.c.bf16 %v505_v15, %v504_v14  ;;  %v697_v14 = vld [vmem:[#allocation7 + $0x150] sm:$0xff]  ;;  %v698_v15 = vld [vmem:[#allocation7 + $0x158] sm:$0xff] }
  0xc9   :  { %1844 = vmatpush1.bf16.msra.mxu0 %v1843_v19  ;;  %v1909_v19 = vpack.c.bf16 %v507_v18, %v506_v17  ;;  %v699_v17 = vld [vmem:[#allocation7 + $0x160] sm:$0xff]  ;;  %v700_v18 = vld [vmem:[#allocation7 + $0x168] sm:$0xff] }
  0xca   :  { %1846 = vmatprep.subr.bf16.mxu0 %v1845_v20  ;;  %v508_v20 = vld [vmem:[#allocation7 + $0x60] sm:$0xff] }
  0xcb   :  { %v1912_v22 = vpack.c.bf16 %v509_v21, %v508_v20  ;;  %v701_v20 = vld [vmem:[#allocation7 + $0x170] sm:$0xff]  ;;  %v702_v21 = vld [vmem:[#allocation7 + $0x178] sm:$0xff] }
  0xcd   :  { %1848 = vmatpush1.bf16.msra.mxu0 %v1847_v25  ;;  %v1915_v25 = vpack.c.bf16 %v511_v24, %v510_v23  ;;  %v783_v23 = vld [vmem:[#allocation7 + $0x180] sm:$0xff]  ;;  %v784_v24 = vld [vmem:[#allocation7 + $0x188] sm:$0xff] }
  0xce   :  { %1850 = vmatprep.subr.bf16.mxu0 %v1849_v26  ;;  %v2228_v26 = vmov 0.0  }
  0xd1   :  { %1852 = vmatpush1.bf16.msra.mxu0 %v1851_v31  ;;  %v591_v31 = vld [vmem:[#allocation7 + $0x80] sm:$0xff] }
  0xd2   :  { %1854 = vmatprep.subr.bf16.mxu0 %v1853_v32  ;;  %v592_v32 = vld [vmem:[#allocation7 + $0x88] sm:$0xff] }
  0xd3   :  { %v1918_v34 = vpack.c.bf16 %v592_v32, %v591_v31  ;;  %v788_v31 = vld [vmem:[#allocation7 + $0x1a8] sm:$0xff] }
  0xd5   :  { %1856 = vmatpush1.bf16.msra.mxu0 %v1855_v37  ;;  %v594_v37 = vld [vmem:[#allocation7 + $0x98] sm:$0xff] }
  0xd6   :  { %1858 = vmatprep.subr.bf16.mxu0 %v1857_v38  ;;  %v1921_v38 = vpack.c.bf16 %v594_v37, %v593_v36  ;;  %v791_v36 = vld [vmem:[#allocation7 + $0x1c0] sm:$0xff]  ;;  %v792_v37 = vld [vmem:[#allocation7 + $0x1c8] sm:$0xff] }
  0xd9   :  { %1860 = vmatpush1.bf16.msra.mxu0 %v1859_v41  ;;  %v1924_v41 = vpack.c.bf16 %v596_v40, %v595_v39  ;;  %v793_v39 = vld [vmem:[#allocation7 + $0x1d0] sm:$0xff]  ;;  %v794_v40 = vld [vmem:[#allocation7 + $0x1d8] sm:$0xff] }
  0xda   :  { %1965 = vmatprep.subr.bf16.mxu0 %v2226_v52 }
  0xdc   :  { %378 = vmatmul.mubr.f32.vlgmr.msra.gmra.mrb[0].mxu0 %v100_v42  ;;  %v597_v42 = vld [vmem:[#allocation7 + $0xb0] sm:$0xff] }
  0xdd   :  { %1590 = vmatprep.mubr.msk.f32.mxu0 %vm2227_vm0, %v2228_v26  ;;  %v1927_v44 = vpack.c.bf16 %v598_v43, %v597_v42  ;;  %v795_v42 = vld [vmem:[#allocation7 + $0x1e0] sm:$0xff]  ;;  %v796_v43 = vld [vmem:[#allocation7 + $0x1e8] sm:$0xff] }
 0x1af   :  { %v379_v60 = vpop.f32.mrb[0].mxu0 }
 0x1b0   :  { %v2085_v61 = vadd.f32 %v379_v60, %v235_v58  ;;  %v381_v62 = vpop.f32.mrb[1].mxu0  ;;  %v1268_v58 = vld [vmem:[%s2467_s6] ss:$0 sm:$0xff]  ;;  %v688_v60 = vld [vmem:[#allocation7 + $0x108] sm:$0xff] }
 0x1b1   :  { %v2086_v1 = vadd.f32 %v381_v62, %v239_v59  ;;  %v687_v59 = vld [vmem:[#allocation7 + $0x100] sm:$0xff] }
 0x1b2   :  { %v384_v4 = vmax.f32 %v2085_v61, 0.0  ;;  %v1942_v0 = vpack.c.bf16 %v688_v60, %v687_v59  ;;  %v883_v60 = vld [vmem:[#allocation7 + $0x220] sm:$0xff] }
 0x1b3   :  { %v385_v2 = vmax.f32 %v2086_v1, 0.0 }
 0x1b5   :  { %489 = vmatprep.mubr.f32.mxu1 %v385_v2  ;;  %v689_v2 = vld [vmem:[#allocation7 + $0x110] sm:$0xff] }
 0x1b6   :  { %490 = vmatmul.mubr.f32.vlgmr.msra.gmra.mrb[0].mxu1 %v384_v4 }
 0x1b7   :  { %1895 = vmatpush3.bf16.msra.mxu1 %v1894_v3  ;;  %1485 = vmatprep.mubr.msk.f32.mxu1 %vm2227_vm0, %v2228_v26  ;;  %v690_v3 = vld [vmem:[#allocation7 + $0x118] sm:$0xff] }
 0x1b8   :  { %1896 = vmatprep.subr.bf16.mxu1 %v2226_v52  ;;  %v1945_v4 = vpack.c.bf16 %v690_v3, %v689_v2  ;;  %v887_v2 = vld [vmem:[#allocation7 + $0x240] sm:$0xff]  ;;  %v888_v3 = vld [vmem:[#allocation7 + $0x248] sm:$0xff] }
 0x1bb   :  { %1898 = vmatpush3.bf16.msra.mxu1 %v1897_v7  ;;  %v1948_v7 = vpack.c.bf16 %v692_v6, %v691_v5  ;;  %v889_v5 = vld [vmem:[#allocation7 + $0x250] sm:$0xff]  ;;  %v890_v6 = vld [vmem:[#allocation7 + $0x258] sm:$0xff] }
 0x1bc   :  { %1899 = vmatprep.subr.bf16.mxu1 %v2226_v52 }
 0x1bf   :  { %1901 = vmatpush3.bf16.msra.mxu1 %v1900_v10  ;;  %v1951_v10 = vpack.c.bf16 %v694_v9, %v693_v8  ;;  %v891_v8 = vld [vmem:[#allocation7 + $0x260] sm:$0xff]  ;;  %v892_v9 = vld [vmem:[#allocation7 + $0x268] sm:$0xff] }
 0x1c0   :  { %1902 = vmatprep.subr.bf16.mxu1 %v2226_v52 }
 0x1c3   :  { %1904 = vmatpush3.bf16.msra.mxu1 %v1903_v13  ;;  %v1954_v13 = vpack.c.bf16 %v696_v12, %v695_v11  ;;  %v1272_v11 = vld [vmem:[%s2467_s6 + $0x2] ss:$0 sm:$0xff] }
 0x1c4   :  { %1905 = vmatprep.subr.bf16.mxu1 %v2226_v52 }
 0x1c7   :  { %1907 = vmatpush3.bf16.msra.mxu1 %v1906_v16  ;;  %v1957_v16 = vpack.c.bf16 %v698_v15, %v697_v14 }
 0x1c8   :  { %1908 = vmatprep.subr.bf16.mxu1 %v2226_v52 }
 0x1cb   :  { %1910 = vmatpush3.bf16.msra.mxu1 %v1909_v19  ;;  %v1960_v19 = vpack.c.bf16 %v700_v18, %v699_v17  ;;  %v894_v17 = vld [vmem:[#allocation7 + $0x278] sm:$0xff] }
 0x1cc   :  { %1911 = vmatprep.subr.bf16.mxu1 %v2226_v52 }
 0x1cf   :  { %1913 = vmatpush3.bf16.msra.mxu1 %v1912_v22  ;;  %v1963_v22 = vpack.c.bf16 %v702_v21, %v701_v20  ;;  %v976_v20 = vld [vmem:[#allocation7 + $0x288] sm:$0xff]  ;;  %v977_v21 = vld [vmem:[#allocation7 + $0x290] sm:$0xff] }
 0x1d0   :  { %1914 = vmatprep.subr.bf16.mxu1 %v2226_v52 }
 0x1d3   :  { %1916 = vmatpush3.bf16.msra.mxu1 %v1915_v25  ;;  %v785_v25 = vld [vmem:[#allocation7 + $0x190] sm:$0xff] }
 0x1d4   :  { %1917 = vmatprep.subr.bf16.mxu1 %v2226_v52 }
 0x289   :  { %v1314_v27 = vpop.f32.mrb[0].mxu1 }
 0x28a   :  { %v1315_v29 = vpop.f32.mrb[1].mxu1 }
 0x28b   :  { %v1316_v30 = vadd.f32 %v1315_v29, %v1314_v27  ;;  %v1966_v27 = vpack.c.bf16 %v784_v24, %v783_v23  ;;  %v978_v23 = vld [vmem:[#allocation7 + $0x298] sm:$0xff] }
 0x28c   :  { %v2017_v24 = vpack.c.bf16 %v978_v23, %v977_v21  ;;  %v1170_v21 = vld [vmem:[#allocation9 + $0x20] sm:$0xff] }
 0x28d   :  { %v492_v33 = vadd.f32 %v1316_v30, %v1267_v28  ;;  %v786_v28 = vld [vmem:[#allocation7 + $0x198] sm:$0xff]  ;;  %1967 = vmatpush3.bf16.msra.mxu0 %v1966_v27  ;;  %v787_v30 = vld [vmem:[#allocation7 + $0x1a0] sm:$0xff]  ;;  %v980_v27 = vld [vmem:[#allocation7 + $0x2a8] sm:$0xff] }
 0x28e   :  { %v1969_v29 = vpack.c.bf16 %v786_v28, %v785_v25  ;;  %1968 = vmatprep.subr.bf16.mxu0 %v2226_v52  ;;  %v1972_v32 = vpack.c.bf16 %v788_v31, %v787_v30  ;;  %v979_v25 = vld [vmem:[#allocation7 + $0x2a0] sm:$0xff]  ;;  %v982_v30 = vld [vmem:[#allocation7 + $0x2b8] sm:$0xff] }
 0x28f   :  { %v495_v35 = vmax.f32 %v492_v33, 0.0  ;;  %v789_v33 = vld [vmem:[#allocation7 + $0x1b0] sm:$0xff]  ;;  %v2020_v28 = vpack.c.bf16 %v980_v27, %v979_v25  ;;  %v1174_v27 = vld [vmem:[#allocation9 + $0x40] sm:$0xff] }
 0x291   :  { %1486 = vmatmul.mubr.f32.vlgmr.msra.gmra.mrb[2].mxu1 %v495_v35  ;;  %1970 = vmatpush3.bf16.msra.mxu0 %v1969_v29  ;;  %v981_v29 = vld [vmem:[#allocation7 + $0x2b0] sm:$0xff] }
 0x292   :  { %1919 = vmatpush3.bf16.msra.mxu1 %v1918_v34  ;;  %1520 = vmatprep.mubr.msk.f32.mxu1 %vm2227_vm0, %v2228_v26  ;;  %v790_v34 = vld [vmem:[#allocation7 + $0x1b8] sm:$0xff]  ;;  %v2023_v31 = vpack.c.bf16 %v982_v30, %v981_v29  ;;  %v1176_v30 = vld [vmem:[#allocation9 + $0x50] sm:$0xff] }
 0x293   :  { %1920 = vmatprep.subr.bf16.mxu1 %v2226_v52  ;;  %1971 = vmatprep.subr.bf16.mxu0 %v2226_v52  ;;  %v1975_v35 = vpack.c.bf16 %v790_v34, %v789_v33  ;;  %v984_v33 = vld [vmem:[#allocation7 + $0x2c8] sm:$0xff] }
 0x295   :  { %1973 = vmatpush3.bf16.msra.mxu0 %v1972_v32  ;;  %v983_v32 = vld [vmem:[#allocation7 + $0x2c0] sm:$0xff] }
 0x296   :  { %1922 = vmatpush3.bf16.msra.mxu1 %v1921_v38  ;;  %1974 = vmatprep.subr.bf16.mxu0 %v2226_v52  ;;  %v1978_v38 = vpack.c.bf16 %v792_v37, %v791_v36  ;;  %v2026_v34 = vpack.c.bf16 %v984_v33, %v983_v32  ;;  %v986_v36 = vld [vmem:[#allocation7 + $0x2d8] sm:$0xff]  ;;  %v1178_v33 = vld [vmem:[#allocation9 + $0x60] sm:$0xff] }
 0x297   :  { %1923 = vmatprep.subr.bf16.mxu1 %v2226_v52 }
 0x299   :  { %1976 = vmatpush3.bf16.msra.mxu0 %v1975_v35  ;;  %v985_v35 = vld [vmem:[#allocation7 + $0x2d0] sm:$0xff] }
 0x29a   :  { %1925 = vmatpush3.bf16.msra.mxu1 %v1924_v41  ;;  %1977 = vmatprep.subr.bf16.mxu0 %v2226_v52  ;;  %v1981_v41 = vpack.c.bf16 %v794_v40, %v793_v39  ;;  %v2029_v37 = vpack.c.bf16 %v986_v36, %v985_v35  ;;  %v988_v39 = vld [vmem:[#allocation7 + $0x2e8] sm:$0xff]  ;;  %v1278_v36 = vld [vmem:[%s2467_s6 + $0x5] ss:$0 sm:$0xff] }
 0x29b   :  { %1926 = vmatprep.subr.bf16.mxu1 %v2226_v52 }
 0x29d   :  { %1979 = vmatpush3.bf16.msra.mxu0 %v1978_v38  ;;  %v987_v38 = vld [vmem:[#allocation7 + $0x2e0] sm:$0xff] }
 0x29e   :  { %1928 = vmatpush3.bf16.msra.mxu1 %v1927_v44  ;;  %1980 = vmatprep.subr.bf16.mxu0 %v2226_v52  ;;  %v1984_v44 = vpack.c.bf16 %v796_v43, %v795_v42  ;;  %v2032_v40 = vpack.c.bf16 %v988_v39, %v987_v38 }
 0x29f   :  { %1929 = vmatprep.subr.bf16.mxu1 %v2226_v52 }
 0x2a1   :  { %1982 = vmatpush3.bf16.msra.mxu0 %v1981_v41  ;;  %v1274_v41 = vld [vmem:[%s2467_s6 + $0x3] ss:$0 sm:$0xff] }
 0x2a2   :  { %1931 = vmatpush3.bf16.msra.mxu1 %v1930_v47  ;;  %1983 = vmatprep.subr.bf16.mxu0 %v2226_v52 }
 0x2a3   :  { %1932 = vmatprep.subr.bf16.mxu1 %v2226_v52 }
 0x2a5   :  { %1985 = vmatpush3.bf16.msra.mxu0 %v1984_v44 }
 0x2a6   :  { %1934 = vmatpush3.bf16.msra.mxu1 %v1933_v50  ;;  %1986 = vmatprep.subr.bf16.mxu0 %v2226_v52  ;;  %v797_v50 = vld [vmem:[#allocation7 + $0x1f0] sm:$0xff] }
 0x2a7   :  { %1935 = vmatprep.subr.bf16.mxu1 %v2226_v52  ;;  %v1987_v53 = vpack.c.bf16 %v798_v51, %v797_v50  ;;  %v1072_v50 = vld [vmem:[#allocation7 + $0x308] sm:$0xff]  ;;  %v1073_v51 = vld [vmem:[#allocation7 + $0x310] sm:$0xff] }
 0x2a9   :  { %1988 = vmatpush3.bf16.msra.mxu0 %v1987_v53 }
 0x2aa   :  { %1937 = vmatpush3.bf16.msra.mxu1 %v1936_v54  ;;  %2013 = vmatprep.subr.bf16.mxu0 %v2226_v52  ;;  %v879_v54 = vld [vmem:[#allocation7 + $0x200] sm:$0xff] }
 0x2ab   :  { %1938 = vmatprep.subr.bf16.mxu1 %v2226_v52 }
 0x2ae   :  { %1940 = vmatpush3.bf16.msra.mxu1 %v1939_v57  ;;  %v1990_v57 = vpack.c.bf16 %v880_v55, %v879_v54  ;;  %v1074_v54 = vld [vmem:[#allocation7 + $0x318] sm:$0xff] }
 0x2af   :  { %1941 = vmatprep.subr.bf16.mxu1 %v2226_v52  ;;  %v2041_v55 = vpack.c.bf16 %v1074_v54, %v1073_v51 }
 0x364   :  { %v585_v61 = vpop.f32.mrb[2].mxu1 }
 0x365   :  { %v586_v62 = vadd.f32 %v1268_v58, %v585_v61  ;;  %v1487_v63 = vpop.f32.mrb[3].mxu1  ;;  %v882_v58 = vld [vmem:[#allocation7 + $0x218] sm:$0xff]  ;;  %v884_v61 = vld [vmem:[#allocation7 + $0x228] sm:$0xff] }
 0x366   :  { %v1993_v59 = vpack.c.bf16 %v882_v58, %v881_v56  ;;  %v885_v63 = vld [vmem:[#allocation7 + $0x230] sm:$0xff]  ;;  %v1075_v56 = vld [vmem:[#allocation7 + $0x320] sm:$0xff] }
 0x367   :  { %v589_v1 = vmax.f32 %v586_v62, 0.0  ;;  %v1996_v62 = vpack.c.bf16 %v884_v61, %v883_v60  ;;  %v1078_v60 = vld [vmem:[#allocation7 + $0x338] sm:$0xff] }
 0x369   :  { %1521 = vmatmul.mubr.f32.vlgmr.msra.gmra.mrb[4].mxu1 %v589_v1 }
 0x36a   :  { %1943 = vmatpush3.bf16.msra.mxu1 %v1942_v0  ;;  %1555 = vmatprep.mubr.msk.f32.mxu1 %vm2227_vm0, %v2228_v26  ;;  %v886_v0 = vld [vmem:[#allocation7 + $0x238] sm:$0xff] }
 0x36b   :  { %1944 = vmatprep.subr.bf16.mxu1 %v2226_v52  ;;  %v1999_v1 = vpack.c.bf16 %v886_v0, %v885_v63  ;;  %v1080_v63 = vld [vmem:[#allocation7 + $0x348] sm:$0xff] }
 0x36e   :  { %1946 = vmatpush3.bf16.msra.mxu1 %v1945_v4  ;;  %v2002_v4 = vpack.c.bf16 %v888_v3, %v887_v2  ;;  %v1082_v2 = vld [vmem:[#allocation7 + $0x358] sm:$0xff] }
 0x36f   :  { %1947 = vmatprep.subr.bf16.mxu1 %v2226_v52 }
 0x372   :  { %1949 = vmatpush3.bf16.msra.mxu1 %v1948_v7  ;;  %v2005_v7 = vpack.c.bf16 %v890_v6, %v889_v5  ;;  %v1084_v5 = vld [vmem:[#allocation7 + $0x368] sm:$0xff] }
 0x373   :  { %1950 = vmatprep.subr.bf16.mxu1 %v2226_v52 }
 0x376   :  { %1952 = vmatpush3.bf16.msra.mxu1 %v1951_v10  ;;  %v2008_v10 = vpack.c.bf16 %v892_v9, %v891_v8 }
 0x377   :  { %1953 = vmatprep.subr.bf16.mxu1 %v2226_v52 }
 0x37a   :  { %1955 = vmatpush3.bf16.msra.mxu1 %v1954_v13 }
 0x37b   :  { %1956 = vmatprep.subr.bf16.mxu1 %v2226_v52 }
 0x37e   :  { %1958 = vmatpush3.bf16.msra.mxu1 %v1957_v16  ;;  %v893_v16 = vld [vmem:[#allocation7 + $0x270] sm:$0xff] }
 0x37f   :  { %1959 = vmatprep.subr.bf16.mxu1 %v2226_v52  ;;  %v2011_v18 = vpack.c.bf16 %v894_v17, %v893_v16  ;;  %v1167_v16 = vld [vmem:[#allocation9 + $0x8] sm:$0xff]  ;;  %v1168_v17 = vld [vmem:[#allocation9 + $0x10] sm:$0xff] }
 0x382   :  { %1961 = vmatpush3.bf16.msra.mxu1 %v1960_v19  ;;  %v975_v19 = vld [vmem:[#allocation7 + $0x280] sm:$0xff] }
 0x383   :  { %1962 = vmatprep.subr.bf16.mxu1 %v2226_v52 }
 0x386   :  { %1964 = vmatpush3.bf16.msra.mxu1 %v1963_v22  ;;  %v2014_v22 = vpack.c.bf16 %v976_v20, %v975_v19  ;;  %v1169_v19 = vld [vmem:[#allocation9 + $0x18] sm:$0xff] }
 0x387   :  { %1989 = vmatprep.subr.bf16.mxu1 %v2226_v52  ;;  %v2065_v20 = vpack.c.bf16 %v1169_v19, %v1168_v17 }
 0x43c   :  { %v681_v46 = vpop.f32.mrb[4].mxu1 }
 0x43d   :  { %v682_v47 = vadd.f32 %v1270_v45, %v681_v46  ;;  %v1522_v48 = vpop.f32.mrb[5].mxu1  ;;  %v989_v46 = vld [vmem:[#allocation7 + $0x2f0] sm:$0xff] }
 0x43f   :  { %v685_v49 = vmax.f32 %v682_v47, 0.0  ;;  %v990_v47 = vld [vmem:[#allocation7 + $0x2f8] sm:$0xff] }
 0x440   :  { %v2035_v48 = vpack.c.bf16 %v990_v47, %v989_v46 }
 0x441   :  { %1556 = vmatmul.mubr.f32.vlgmr.msra.gmra.mrb[6].mxu1 %v685_v49  ;;  %v1071_v49 = vld [vmem:[#allocation7 + $0x300] sm:$0xff] }
 0x442   :  { %1625 = vmatprep.mubr.msk.f32.mxu1 %vm2227_vm0, %v2228_v26  ;;  %1991 = vmatpush3.bf16.msra.mxu1 %v1990_v57  ;;  %v2038_v53 = vpack.c.bf16 %v1072_v50, %v1071_v49  ;;  %v1076_v57 = vld [vmem:[#allocation7 + $0x328] sm:$0xff] }
 0x443   :  { %1992 = vmatprep.subr.bf16.mxu1 %v2226_v52  ;;  %v2044_v58 = vpack.c.bf16 %v1076_v57, %v1075_v56 }
 0x446   :  { %1994 = vmatpush3.bf16.msra.mxu1 %v1993_v59  ;;  %v1077_v59 = vld [vmem:[#allocation7 + $0x330] sm:$0xff] }
 0x447   :  { %1995 = vmatprep.subr.bf16.mxu1 %v2226_v52  ;;  %v2047_v61 = vpack.c.bf16 %v1078_v60, %v1077_v59 }
 0x44a   :  { %1997 = vmatpush3.bf16.msra.mxu1 %v1996_v62  ;;  %v1079_v62 = vld [vmem:[#allocation7 + $0x340] sm:$0xff] }
 0x44b   :  { %1998 = vmatprep.subr.bf16.mxu1 %v2226_v52  ;;  %v2050_v0 = vpack.c.bf16 %v1080_v63, %v1079_v62 }
 0x44e   :  { %2000 = vmatpush3.bf16.msra.mxu1 %v1999_v1  ;;  %v1081_v1 = vld [vmem:[#allocation7 + $0x350] sm:$0xff] }
 0x44f   :  { %2001 = vmatprep.subr.bf16.mxu1 %v2226_v52  ;;  %v2053_v3 = vpack.c.bf16 %v1082_v2, %v1081_v1 }
 0x452   :  { %2003 = vmatpush3.bf16.msra.mxu1 %v2002_v4  ;;  %v1083_v4 = vld [vmem:[#allocation7 + $0x360] sm:$0xff] }
 0x453   :  { %2004 = vmatprep.subr.bf16.mxu1 %v2226_v52  ;;  %v2056_v6 = vpack.c.bf16 %v1084_v5, %v1083_v4 }
 0x456   :  { %2006 = vmatpush3.bf16.msra.mxu1 %v2005_v7  ;;  %v1276_v7 = vld [vmem:[%s2467_s6 + $0x4] ss:$0 sm:$0xff] }
 0x457   :  { %2007 = vmatprep.subr.bf16.mxu1 %v2226_v52 }
 0x45a   :  { %2009 = vmatpush3.bf16.msra.mxu1 %v2008_v10 }
 0x45b   :  { %2010 = vmatprep.subr.bf16.mxu1 %v2226_v52 }
 0x45e   :  { %2012 = vmatpush3.bf16.msra.mxu1 %v2011_v18 }
 0x45f   :  { %2037 = vmatprep.subr.bf16.mxu1 %v2226_v52 }
 0x514   :  { %v777_v12 = vpop.f32.mrb[6].mxu1 }
 0x515   :  { %v778_v13 = vadd.f32 %v1272_v11, %v777_v12  ;;  %v1557_v14 = vpop.f32.mrb[7].mxu1  ;;  %v1085_v12 = vld [vmem:[#allocation7 + $0x370] sm:$0xff] }
 0x517   :  { %v781_v15 = vmax.f32 %v778_v13, 0.0  ;;  %v1086_v13 = vld [vmem:[#allocation7 + $0x378] sm:$0xff] }
 0x518   :  { %v2059_v14 = vpack.c.bf16 %v1086_v13, %v1085_v12 }
 0x519   :  { %1591 = vmatmul.mubr.f32.vlgmr.msra.gmra.mrb[2].mxu0 %v781_v15  ;;  %v1166_v15 = vld [vmem:[#allocation9] sm:$0xff] }
 0x51a   :  { %1660 = vmatprep.mubr.msk.f32.mxu0 %vm2227_vm0, %v2228_v26  ;;  %2015 = vmatpush3.bf16.msra.mxu0 %v2014_v22  ;;  %v2062_v18 = vpack.c.bf16 %v1167_v16, %v1166_v15  ;;  %v1171_v22 = vld [vmem:[#allocation9 + $0x28] sm:$0xff] }
 0x51b   :  { %2016 = vmatprep.subr.bf16.mxu0 %v2226_v52  ;;  %v2068_v23 = vpack.c.bf16 %v1171_v22, %v1170_v21 }
 0x51e   :  { %2018 = vmatpush3.bf16.msra.mxu0 %v2017_v24  ;;  %v1173_v24 = vld [vmem:[#allocation9 + $0x38] sm:$0xff] }
 0x51f   :  { %2019 = vmatprep.subr.bf16.mxu0 %v2226_v52 }
 0x522   :  { %2021 = vmatpush3.bf16.msra.mxu0 %v2020_v28  ;;  %v1175_v28 = vld [vmem:[#allocation9 + $0x48] sm:$0xff] }
 0x523   :  { %2022 = vmatprep.subr.bf16.mxu0 %v2226_v52  ;;  %v2074_v29 = vpack.c.bf16 %v1175_v28, %v1174_v27 }
 0x526   :  { %2024 = vmatpush3.bf16.msra.mxu0 %v2023_v31  ;;  %v1177_v31 = vld [vmem:[#allocation9 + $0x58] sm:$0xff] }
 0x527   :  { %2025 = vmatprep.subr.bf16.mxu0 %v2226_v52  ;;  %v2077_v32 = vpack.c.bf16 %v1177_v31, %v1176_v30 }
 0x52a   :  { %2027 = vmatpush3.bf16.msra.mxu0 %v2026_v34  ;;  %v1179_v34 = vld [vmem:[#allocation9 + $0x68] sm:$0xff] }
 0x52b   :  { %2028 = vmatprep.subr.bf16.mxu0 %v2226_v52  ;;  %v2080_v35 = vpack.c.bf16 %v1179_v34, %v1178_v33 }
 0x52e   :  { %2030 = vmatpush3.bf16.msra.mxu0 %v2029_v37 }
 0x52f   :  { %2031 = vmatprep.subr.bf16.mxu0 %v2226_v52 }
 0x532   :  { %2033 = vmatpush3.bf16.msra.mxu0 %v2032_v40 }
 0x533   :  { %2034 = vmatprep.subr.bf16.mxu0 %v2226_v52 }
 0x536   :  { %2036 = vmatpush3.bf16.msra.mxu0 %v2035_v48  ;;  %v1281_v48 = vld [vmem:[%s2469_s8] ss:$0 sm:$0xff] }
 0x537   :  { %2061 = vmatprep.subr.bf16.mxu0 %v2226_v52 }
 0x5ec   :  { %v873_v42 = vpop.f32.mrb[2].mxu0 }
 0x5ed   :  { %v874_v43 = vadd.f32 %v1274_v41, %v873_v42  ;;  %v1592_v44 = vpop.f32.mrb[3].mxu0  ;;  %v1180_v41 = vld [vmem:[#allocation9 + $0x70] sm:$0xff]  ;;  %v1181_v42 = vld [vmem:[#allocation9 + $0x78] sm:$0xff] }
 0x5ee   :  { %v1280_v44 = vld [vmem:[%s2467_s6 + $0x6] ss:$0 sm:$0xff] }
 0x5ef   :  { %v877_v45 = vmax.f32 %v874_v43, 0.0  ;;  %v2083_v43 = vpack.c.bf16 %v1181_v42, %v1180_v41 }
 0x5f1   :  { %1626 = vmatmul.mubr.f32.vlgmr.msra.gmra.mrb[8].mxu1 %v877_v45 }
 0x5f2   :  { %1695 = vmatprep.mubr.msk.f32.mxu1 %vm2227_vm0, %v2228_v26  ;;  %2039 = vmatpush3.bf16.msra.mxu1 %v2038_v53 }
 0x5f3   :  { %2040 = vmatprep.subr.bf16.mxu1 %v2226_v52 }
 0x5f6   :  { %2042 = vmatpush3.bf16.msra.mxu1 %v2041_v55 }
 0x5f7   :  { %2043 = vmatprep.subr.bf16.mxu1 %v2226_v52 }
 0x5fa   :  { %2045 = vmatpush3.bf16.msra.mxu1 %v2044_v58 }
 0x5fb   :  { %2046 = vmatprep.subr.bf16.mxu1 %v2226_v52 }
 0x5fe   :  { %2048 = vmatpush3.bf16.msra.mxu1 %v2047_v61 }
 0x5ff   :  { %2049 = vmatprep.subr.bf16.mxu1 %v2226_v52 }
 0x602   :  { %2051 = vmatpush3.bf16.msra.mxu1 %v2050_v0 }
 0x603   :  { %2052 = vmatprep.subr.bf16.mxu1 %v2226_v52 }
 0x606   :  { %2054 = vmatpush3.bf16.msra.mxu1 %v2053_v3 }
 0x607   :  { %2055 = vmatprep.subr.bf16.mxu1 %v2226_v52 }
 0x60a   :  { %2057 = vmatpush3.bf16.msra.mxu1 %v2056_v6 }
 0x60b   :  { %2058 = vmatprep.subr.bf16.mxu1 %v2226_v52 }
 0x60e   :  { %2060 = vmatpush3.bf16.msra.mxu1 %v2059_v14 }
 0x6c4   :  { %v969_v8 = vpop.f32.mrb[8].mxu1 }
 0x6c5   :  { %v970_v9 = vadd.f32 %v1276_v7, %v969_v8  ;;  %v1627_v10 = vpop.f32.mrb[9].mxu1 }
 0x6c7   :  { %v973_v11 = vmax.f32 %v970_v9, 0.0 }
 0x6c9   :  { %1661 = vmatmul.mubr.f32.vlgmr.msra.gmra.mrb[4].mxu0 %v973_v11 }
 0x6ca   :  { %1730 = vmatprep.mubr.msk.f32.mxu0 %vm2227_vm0, %v2228_v26  ;;  %2063 = vmatpush3.bf16.msra.mxu0 %v2062_v18  ;;  %v1172_v26 = vld [vmem:[#allocation9 + $0x30] sm:$0xff] }
 0x6cb   :  { %2064 = vmatprep.subr.bf16.mxu0 %v2226_v52  ;;  %v2071_v25 = vpack.c.bf16 %v1173_v24, %v1172_v26 }
 0x6ce   :  { %2066 = vmatpush3.bf16.msra.mxu0 %v2065_v20 }
 0x6cf   :  { %2067 = vmatprep.subr.bf16.mxu0 %v2226_v52 }
 0x6d2   :  { %2069 = vmatpush3.bf16.msra.mxu0 %v2068_v23 }
 0x6d3   :  { %2070 = vmatprep.subr.bf16.mxu0 %v2226_v52 }
 0x6d6   :  { %2072 = vmatpush3.bf16.msra.mxu0 %v2071_v25 }
 0x6d7   :  { %2073 = vmatprep.subr.bf16.mxu0 %v2226_v52 }
 0x6da   :  { %2075 = vmatpush3.bf16.msra.mxu0 %v2074_v29 }
 0x6db   :  { %2076 = vmatprep.subr.bf16.mxu0 %v2226_v52 }
 0x6de   :  { %2078 = vmatpush3.bf16.msra.mxu0 %v2077_v32 }
 0x6df   :  { %2079 = vmatprep.subr.bf16.mxu0 %v2226_v52 }
 0x6e2   :  { %2081 = vmatpush3.bf16.msra.mxu0 %v2080_v35 }
 0x6e3   :  { %2082 = vmatprep.subr.bf16.mxu0 %v2226_v52 }
 0x6e6   :  { %2084 = vmatpush3.bf16.msra.mxu0 %v2083_v43 }
 0x79c   :  { %v1065_v37 = vpop.f32.mrb[4].mxu0 }
 0x79d   :  { %v1066_v38 = vadd.f32 %v1278_v36, %v1065_v37  ;;  %v1662_v39 = vpop.f32.mrb[5].mxu0 }
 0x79f   :  { %v1069_v40 = vmax.f32 %v1066_v38, 0.0 }
 0x7a1   :  { %1696 = vmatmul.mubr.f32.vlgmr.msra.gmra.mrb[10].mxu1 %v1069_v40 }
 0x874   :  { %v1161_v45 = vpop.f32.mrb[10].mxu1 }
 0x875   :  { %v1162_v46 = vadd.f32 %v1280_v44, %v1161_v45  ;;  %v1697_v52 = vpop.f32.mrb[11].mxu1 }
 0x877   :  { %v1165_v47 = vmax.f32 %v1162_v46, 0.0 }
 0x879   :  { %1731 = vmatmul.mubr.f32.vlgmr.msra.gmra.mrb[6].mxu0 %v1165_v47 }
 0x94c   :  { %v1255_v49 = vpop.f32.mrb[6].mxu0 }
 0x94d   :  { %v1256_v50 = vadd.f32 %v1281_v48, %v1255_v49  ;;  %v1732_v51 = vpop.f32.mrb[7].mxu0 }
 0x94f   :  { %1259 = vst [vmem:[%s2470_s9] sm:$0xff] %v1256_v50 }
 0x950   :  { %1264 = vsyncpa [#allocation3], 1 }
 0x951   :  { %1265 = vsyncpa [#allocation5], 1 }
 0x952   :  { %1266 = vsyncpa [#allocation8], 1 }

</bundles_post_ra>
